<compile_context>
chip_gen: v7x
topology: tpu7x:2x2x1
jax: 0.10.0
libtpu: 0.0.40
codegen_flags: <defaults>
</compile_context>

<pallas_src>
import functools
import math

import jax
import jax.numpy as jnp
from jax.experimental import pallas as pl
from jax.experimental.pallas import tpu as pltpu


def _round_up(x, m):
    return ((x + m - 1) // m) * m


def _nbytes(shape, dtype):
    return math.prod(shape) * jnp.dtype(dtype).itemsize


def gru_fc_kernel(x_ref, wih_ref, whh_ref, bgi_ref, bhn_ref, fcw_ref, fcb_ref,
                  out_ref, gi_ref, h_ref, *, seq_len, needs_mask, unroll):
    """One T-chunk of the GRU per grid step; final fc on the last chunk.

    x_ref   : (Tc, Bp, H)  compute dtype (current chunk of embedded tokens)
    wih_ref : (H, 3H)      compute dtype (W_ih^T)
    whh_ref : (H, 3H)      compute dtype (W_hh^T)
    bgi_ref : (1, 3H)      f32  (b_ih with the r/z slices of b_hh folded in)
    bhn_ref : (1, H)       f32  (n-gate slice of b_hh; must stay inside r*(...))
    fcw_ref : (H, Vp)      compute dtype (fc W^T, V padded to 128)
    fcb_ref : (1, Vp)      f32
    out_ref : (Bp, Vp)     f32  (written only on the last chunk)
    gi_ref  : (Tc, Bp, 3H) VMEM scratch (hoisted input projection)
    h_ref   : (Bp, H)      f32 VMEM scratch, persists across chunks

    PyTorch nn.GRU gate order [r, z, n]; n = tanh(i_n + r*(h@W_hn^T + b_hn));
    h' = (1 - z)*n + z*h.
    """
    c = pl.program_id(0)
    Tc, Bp, H = x_ref.shape

    @pl.when(c == 0)
    def _init():
        h_ref[...] = jnp.zeros_like(h_ref)

    # ---- Phase 1: hoisted input projection for the whole chunk (one MXU matmul).
    # (Tc,Bp,H)->(Tc*Bp,H) is a free view because Bp % sublane == 0 and H % 128 == 0.
    x_all = x_ref[...].reshape(Tc * Bp, H)
    gi_all = jnp.dot(x_all, wih_ref[...], preferred_element_type=jnp.float32)
    gi_ref[...] = (gi_all + bgi_ref[...]).reshape(Tc, Bp, 3 * H).astype(gi_ref.dtype)

    # ---- Phase 2: serial recurrence over this chunk.
    # n-gate bias broadcast hoisted once (JAX does not CSE broadcast_in_dim).
    bhn = jnp.broadcast_to(bhn_ref[...], (Bp, H))
    base = c * Tc

    def step(t, h_prev):
        gi = gi_ref[t].astype(jnp.float32)                          # (Bp, 3H)
        # W_hh read inside the step: per-iteration live range under unroll.
        gh = jnp.dot(h_prev.astype(whh_ref.dtype), whh_ref[...],
                     preferred_element_type=jnp.float32)            # (Bp, 3H)
        r = jax.nn.sigmoid(gi[:, 0 * H:1 * H] + gh[:, 0 * H:1 * H])
        z = jax.nn.sigmoid(gi[:, 1 * H:2 * H] + gh[:, 1 * H:2 * H])
        n = jnp.tanh(gi[:, 2 * H:3 * H] + r * (gh[:, 2 * H:3 * H] + bhn))
        h_new = (1.0 - z) * n + z * h_prev
        if needs_mask:
            h_new = jnp.where(base + t < seq_len, h_new, h_prev)
        return h_new

    h_ref[...] = jax.lax.fori_loop(0, Tc, step, h_ref[...], unroll=unroll)

    # ---- Phase 3: final fc on the last hidden state, lane-dense (Bp, Vp) store.
    @pl.when(c == pl.num_programs(0) - 1)
    def _fc():
        logits = jnp.dot(h_ref[...].astype(fcw_ref.dtype), fcw_ref[...],
                         preferred_element_type=jnp.float32) + fcb_ref[...]
        out_ref[...] = logits.astype(out_ref.dtype)


def prepare_params(params, compute_dtype=jnp.float32):
    """One-time weight prep: transpose, fold biases, pad V, optional bf16 cast.

    bf16 weights are fine on v5e as well as v6e/v7x: the MXU takes bf16 inputs
    at full rate, the gate math stays f32, and all dots accumulate in f32.
    """
    V, H = params["embedding"].shape
    Vp = _round_up(V, 128)
    fc_w_t = jnp.transpose(params["fc_w"]).astype(compute_dtype)          # (H, V)
    fc_b = params["fc_b"].reshape(1, V).astype(jnp.float32)
    if Vp != V:
        fc_w_t = jnp.pad(fc_w_t, ((0, 0), (0, Vp - V)))
        fc_b = jnp.pad(fc_b, ((0, 0), (0, Vp - V)))
    b_ih = params["b_ih"].astype(jnp.float32)
    b_hh = params["b_hh"].astype(jnp.float32)
    # Fold the r/z slices of b_hh into the hoisted input-projection bias; only
    # the n-gate slice must remain in the per-step path (inside r*(...)).
    b_gi = b_ih.at[:2 * H].add(b_hh[:2 * H]).reshape(1, 3 * H)
    b_hn = b_hh[2 * H:3 * H].reshape(1, H)
    return {
        "embedding": params["embedding"].astype(jnp.float32),             # (V, H)
        "w_ih_t": jnp.transpose(params["w_ih"]).astype(compute_dtype),    # (H, 3H)
        "w_hh_t": jnp.transpose(params["w_hh"]).astype(compute_dtype),    # (H, 3H)
        "b_gi": b_gi,                                                     # (1, 3H)
        "b_hn": b_hn,                                                     # (1, H)
        "fc_w_t": fc_w_t,                                                 # (H, Vp)
        "fc_b": fc_b,                                                     # (1, Vp)
    }


def gru_model_forward(token_ids, dev_params):
    """token_ids: (B, T) int32.  Returns logits (B, V) f32."""
    emb = dev_params["embedding"]
    w_ih_t = dev_params["w_ih_t"]
    w_hh_t = dev_params["w_hh_t"]
    b_gi = dev_params["b_gi"]
    b_hn = dev_params["b_hn"]
    fc_w_t = dev_params["fc_w_t"]
    fc_b = dev_params["fc_b"]

    B, T = token_ids.shape
    V, H = emb.shape
    Vp = fc_w_t.shape[1]
    cdt = w_ih_t.dtype
    # bf16 packs 16 sublanes per vreg -> pad B to 16 so gate math fills vregs.
    sub = 16 if cdt == jnp.bfloat16 else 8
    Bp = _round_up(max(B, sub), sub)

    # Embedding lookup, gathered time-major directly (no (B,T,H) transpose copy).
    x = jnp.take(emb, token_ids.T, axis=0)                      # (T, B, H)
    if Bp != B:
        x = jnp.pad(x, ((0, 0), (0, Bp - B), (0, 0)))
    x = x.astype(cdt)

    # T-chunk streaming: x is DMA'd chunk-by-chunk (double-buffered by the
    # BlockSpec pipeline), so VMEM residency is O(Tc*Bp*H), not O(T*Bp*H).
    Tc = min(T, 64)
    Tp = _round_up(T, Tc)
    if Tp != T:
        x = jnp.pad(x, ((0, Tp - T), (0, 0), (0, 0)))
    num_chunks = Tp // Tc

    gi_dtype = jnp.bfloat16 if cdt == jnp.bfloat16 else jnp.float32

    kernel = functools.partial(gru_fc_kernel, seq_len=T, needs_mask=(Tp != T),
                               unroll=min(8, Tc))

    const = lambda c: (0, 0)
    grid_spec = pltpu.PrefetchScalarGridSpec(
        num_scalar_prefetch=0,
        grid=(num_chunks,),
        in_specs=[
            pl.BlockSpec((Tc, Bp, H), lambda c: (c, 0, 0)),     # x, streamed
            pl.BlockSpec((H, 3 * H), const),                    # W_ih^T (resident)
            pl.BlockSpec((H, 3 * H), const),                    # W_hh^T (resident)
            pl.BlockSpec((1, 3 * H), const),                    # folded gi bias
            pl.BlockSpec((1, H), const),                        # n-gate b_hh bias
            pl.BlockSpec((H, Vp), const),                       # fc W^T
            pl.BlockSpec((1, Vp), const),                       # fc bias
        ],
        out_specs=pl.BlockSpec((Bp, Vp), const),
        scratch_shapes=[
            pltpu.VMEM((Tc, Bp, 3 * H), gi_dtype),              # hoisted projection
            pltpu.VMEM((Bp, H), jnp.float32),                   # carried hidden state
        ],
    )

    # Size scoped VMEM from the actual resident footprint (double-buffered
    # inputs + output + scratch) with headroom; defaults are 16/32 MiB.
    resident = (
        2 * (_nbytes((Tc, Bp, H), cdt) + 2 * _nbytes((H, 3 * H), cdt)
             + _nbytes((1, 3 * H), jnp.float32) + _nbytes((1, H), jnp.float32)
             + _nbytes((H, Vp), cdt) + _nbytes((1, Vp), jnp.float32))
        + 2 * _nbytes((Bp, Vp), jnp.float32)
        + _nbytes((Tc, Bp, 3 * H), gi_dtype)
        + _nbytes((Bp, H), jnp.float32)
    )
    vmem_limit = int(min(max(2 * resident + (4 << 20), 8 << 20), 64 << 20))

    out = pl.pallas_call(
        kernel,
        out_shape=jax.ShapeDtypeStruct((Bp, Vp), jnp.float32),
        grid_spec=grid_spec,
        compiler_params=pltpu.CompilerParams(
            dimension_semantics=("arbitrary",),   # recurrence is serial over chunks
            vmem_limit_bytes=vmem_limit,
        ),
    )(x, w_ih_t, w_hh_t, b_gi, b_hn, fc_w_t, fc_b)

    return out[:B, :V]


def reference_forward(token_ids, params):
    """Pure-JAX f32 reference reproducing PyTorch nn.GRU semantics."""
    emb = params["embedding"]
    w_ih, w_hh = params["w_ih"], params["w_hh"]
    b_ih, b_hh = params["b_ih"], params["b_hh"]
    fc_w, fc_b = params["fc_w"], params["fc_b"]
    H = emb.shape[1]
    x = jnp.take(emb, token_ids, axis=0)                        # (B, T, H)
    B, T, _ = x.shape
    h = jnp.zeros((B, H), jnp.float32)
    for t in range(T):
        gi = x[:, t, :] @ w_ih.T + b_ih
        gh = h @ w_hh.T + b_hh
        r = jax.nn.sigmoid(gi[:, :H] + gh[:, :H])
        z = jax.nn.sigmoid(gi[:, H:2 * H] + gh[:, H:2 * H])
        n = jnp.tanh(gi[:, 2 * H:] + r * gh[:, 2 * H:])
        h = (1.0 - z) * n + z * h
    return h @ fc_w.T + fc_b


def init_params(key, vocab_size, hidden_size):
    ks = jax.random.split(key, 7)
    bound = 1.0 / jnp.sqrt(hidden_size)

    def u(k, shape):
        return jax.random.uniform(k, shape, jnp.float32, -bound, bound)

    return {
        "embedding": jax.random.normal(ks[0], (vocab_size, hidden_size), jnp.float32),
        "w_ih": u(ks[1], (3 * hidden_size, hidden_size)),   # PyTorch layout
        "w_hh": u(ks[2], (3 * hidden_size, hidden_size)),
        "b_ih": u(ks[3], (3 * hidden_size,)),
        "b_hh": u(ks[4], (3 * hidden_size,)),
        "fc_w": u(ks[5], (vocab_size, hidden_size)),
        "fc_b": u(ks[6], (vocab_size,)),
    }


if __name__ == "__main__":
    vocab_size = 32      # synthetic "len(vocab)" (input_size == output_size)
    hidden_size = 128
    batch = 2
    seq_len = 8

    key = jax.random.PRNGKey(0)
    k_param, k_data = jax.random.split(key)
    params = init_params(k_param, vocab_size, hidden_size)
    token_ids = jax.random.randint(k_data, (batch, seq_len), 0, vocab_size, jnp.int32)

    ref = reference_forward(token_ids, params)

    forward = jax.jit(gru_model_forward)

    # f32 path: must match the f32 PyTorch-semantics reference tightly.
    dev_params_f32 = prepare_params(params, compute_dtype=jnp.float32)
    logits = jax.block_until_ready(forward(token_ids, dev_params_f32))
    assert logits.shape == (batch, vocab_size)
    assert jnp.allclose(logits, ref, atol=1e-4, rtol=1e-4), "f32 mismatch vs reference"

    # bf16-weight path (all TPU generations): looser tolerance, f32 accumulation.
    # NOTE: bf16 error compounds with T via the h@W_hh quantization; re-validate
    # tolerances at target sequence lengths before deploying long-T workloads.
    dev_params_bf16 = prepare_params(params, compute_dtype=jnp.bfloat16)
    logits_bf16 = jax.block_until_ready(forward(token_ids, dev_params_bf16))
    assert logits_bf16.shape == (batch, vocab_size)
    assert jnp.allclose(logits_bf16, ref, atol=2e-1, rtol=5e-2), "bf16 mismatch vs reference"

    print("KERNEL_OK")
</pallas_src>

<mosaic_0001>
module attributes {stable_mosaic.version = 11 : i64} {
  func.func @gru_fc_kernel(%arg0: i32, %arg1: memref<8x8x128xf32, #tpu.memory_space<vmem>>, %arg2: memref<128x384xf32, #tpu.memory_space<vmem>>, %arg3: memref<128x384xf32, #tpu.memory_space<vmem>>, %arg4: memref<1x384xf32, #tpu.memory_space<vmem>>, %arg5: memref<1x128xf32, #tpu.memory_space<vmem>>, %arg6: memref<128x128xf32, #tpu.memory_space<vmem>>, %arg7: memref<1x128xf32, #tpu.memory_space<vmem>>, %arg8: memref<8x128xf32, #tpu.memory_space<vmem>>, %arg9: memref<8x8x384xf32, #tpu.memory_space<vmem>>, %arg10: memref<8x128xf32, #tpu.memory_space<vmem>>) attributes {dimension_semantics = [#tpu.dimension_semantics<arbitrary>], iteration_bounds = array<i64: 1>, scalar_prefetch = 0 : i64, scratch_operands = 2 : i64, tpu.core_type = #tpu.core_type<tc>, window_params = [{transform_indices = @transform_0, window_bounds = array<i64: 8, 8, 128>}, {pipeline_mode = #tpu.pipeline_mode<synchronous>, transform_indices = @transform_1, window_bounds = array<i64: 128, 384>}, {pipeline_mode = #tpu.pipeline_mode<synchronous>, transform_indices = @transform_2, window_bounds = array<i64: 128, 384>}, {pipeline_mode = #tpu.pipeline_mode<synchronous>, transform_indices = @transform_3, window_bounds = array<i64: 1, 384>}, {pipeline_mode = #tpu.pipeline_mode<synchronous>, transform_indices = @transform_4, window_bounds = array<i64: 1, 128>}, {pipeline_mode = #tpu.pipeline_mode<synchronous>, transform_indices = @transform_5, window_bounds = array<i64: 128, 128>}, {pipeline_mode = #tpu.pipeline_mode<synchronous>, transform_indices = @transform_6, window_bounds = array<i64: 1, 128>}, {pipeline_mode = #tpu.pipeline_mode<synchronous>, transform_indices = @transform_7, window_bounds = array<i64: 8, 128>}]} {
    %c0_i32 = arith.constant 0 : i32
    %0 = arith.cmpi eq, %arg0, %c0_i32 : i32
    %1 = arith.extui %0 : i1 to i32
    %c0_i32_0 = arith.constant 0 : i32
    %2 = arith.cmpi ne, %1, %c0_i32_0 : i32
    scf.if %2 {
      %cst_83 = arith.constant 0.000000e+00 : f32
      %276 = vector.broadcast %cst_83 : f32 to vector<8x128xf32>
      %c0_84 = arith.constant 0 : index
      %c0_85 = arith.constant 0 : index
      %277 = vector.load %arg10[%c0_84, %c0_85] : memref<8x128xf32, #tpu.memory_space<vmem>>, vector<8x128xf32>
      tpu.vector_store %arg10[%c0_84, %c0_85], %276 {strides = array<i32>} : memref<8x128xf32, #tpu.memory_space<vmem>>, vector<8x128xf32>,
    } else {
    }
    %c0 = arith.constant 0 : index
    %c0_1 = arith.constant 0 : index
    %c0_2 = arith.constant 0 : index
    %3 = vector.load %arg1[%c0, %c0_1, %c0_2] : memref<8x8x128xf32, #tpu.memory_space<vmem>>, vector<8x8x128xf32>
    %4 = vector.shape_cast %3 : vector<8x8x128xf32> to vector<64x128xf32>
    %c0_3 = arith.constant 0 : index
    %c0_4 = arith.constant 0 : index
    %5 = vector.load %arg2[%c0_3, %c0_4] : memref<128x384xf32, #tpu.memory_space<vmem>>, vector<128x384xf32>
    %cst = arith.constant dense<0.000000e+00> : vector<64x384xf32>
    %6 = tpu.matmul %4, %5, %cst {dimension_numbers = #tpu.dot_dimension_numbers<[1], [0], [0], [1], [0, 0, 1, 1], [], []>} : vector<64x128xf32>, vector<128x384xf32>, vector<64x384xf32> -> vector<64x384xf32>
    %c0_5 = arith.constant 0 : index
    %c0_6 = arith.constant 0 : index
    %7 = vector.load %arg4[%c0_5, %c0_6] : memref<1x384xf32, #tpu.memory_space<vmem>>, vector<1x384xf32>
    %8 = vector.broadcast %7 : vector<1x384xf32> to vector<64x384xf32>
    %9 = arith.addf %6, %8 : vector<64x384xf32>
    %10 = vector.shape_cast %9 : vector<64x384xf32> to vector<8x8x384xf32>
    %c0_7 = arith.constant 0 : index
    %c0_8 = arith.constant 0 : index
    %c0_9 = arith.constant 0 : index
    %11 = vector.load %arg9[%c0_7, %c0_8, %c0_9] : memref<8x8x384xf32, #tpu.memory_space<vmem>>, vector<8x8x384xf32>
    tpu.vector_store %arg9[%c0_7, %c0_8, %c0_9], %10 {strides = array<i32>} : memref<8x8x384xf32, #tpu.memory_space<vmem>>, vector<8x8x384xf32>,
    %c0_10 = arith.constant 0 : index
    %c0_11 = arith.constant 0 : index
    %12 = vector.load %arg5[%c0_10, %c0_11] : memref<1x128xf32, #tpu.memory_space<vmem>>, vector<1x128xf32>
    %13 = vector.shape_cast %12 : vector<1x128xf32> to vector<1x128xf32>
    %14 = vector.broadcast %13 : vector<1x128xf32> to vector<8x128xf32>
    %c0_12 = arith.constant 0 : index
    %c0_13 = arith.constant 0 : index
    %15 = vector.load %arg10[%c0_12, %c0_13] : memref<8x128xf32, #tpu.memory_space<vmem>>, vector<8x128xf32>
    %c0_i32_14 = arith.constant 0 : i32
    %16 = arith.index_cast %c0_i32_14 : i32 to index
    %c0_15 = arith.constant 0 : index
    %c0_16 = arith.constant 0 : index
    %17 = vector.load %arg9[%16, %c0_15, %c0_16] : memref<8x8x384xf32, #tpu.memory_space<vmem>>, vector<1x8x384xf32>
    %18 = vector.shape_cast %17 : vector<1x8x384xf32> to vector<8x384xf32>
    %c0_17 = arith.constant 0 : index
    %c0_18 = arith.constant 0 : index
    %19 = vector.load %arg3[%c0_17, %c0_18] : memref<128x384xf32, #tpu.memory_space<vmem>>, vector<128x384xf32>
    %cst_19 = arith.constant dense<0.000000e+00> : vector<8x384xf32>
    %20 = tpu.matmul %15, %19, %cst_19 {dimension_numbers = #tpu.dot_dimension_numbers<[1], [0], [0], [1], [0, 0, 1, 1], [], []>} : vector<8x128xf32>, vector<128x384xf32>, vector<8x384xf32> -> vector<8x384xf32>
    %21 = vector.extract_strided_slice %18 {offsets = [0, 0], sizes = [8, 128], strides = [1, 1]} : vector<8x384xf32> to vector<8x128xf32>
    %22 = vector.extract_strided_slice %20 {offsets = [0, 0], sizes = [8, 128], strides = [1, 1]} : vector<8x384xf32> to vector<8x128xf32>
    %23 = arith.addf %21, %22 : vector<8x128xf32>
    %24 = arith.negf %23 : vector<8x128xf32>
    %25 = math.exp %24 : vector<8x128xf32>
    %cst_20 = arith.constant 1.000000e+00 : f32
    %26 = vector.broadcast %cst_20 : f32 to vector<8x128xf32>
    %27 = arith.addf %26, %25 : vector<8x128xf32>
    %28 = arith.divf %26, %27 : vector<8x128xf32>
    %29 = vector.extract_strided_slice %18 {offsets = [0, 128], sizes = [8, 128], strides = [1, 1]} : vector<8x384xf32> to vector<8x128xf32>
    %30 = vector.extract_strided_slice %20 {offsets = [0, 128], sizes = [8, 128], strides = [1, 1]} : vector<8x384xf32> to vector<8x128xf32>
    %31 = arith.addf %29, %30 : vector<8x128xf32>
    %32 = arith.negf %31 : vector<8x128xf32>
    %33 = math.exp %32 : vector<8x128xf32>
    %cst_21 = arith.constant 1.000000e+00 : f32
    %34 = vector.broadcast %cst_21 : f32 to vector<8x128xf32>
    %35 = arith.addf %34, %33 : vector<8x128xf32>
    %36 = arith.divf %34, %35 : vector<8x128xf32>
    %37 = vector.extract_strided_slice %18 {offsets = [0, 256], sizes = [8, 128], strides = [1, 1]} : vector<8x384xf32> to vector<8x128xf32>
    %38 = vector.extract_strided_slice %20 {offsets = [0, 256], sizes = [8, 128], strides = [1, 1]} : vector<8x384xf32> to vector<8x128xf32>
    %39 = arith.addf %38, %14 : vector<8x128xf32>
    %40 = arith.mulf %28, %39 : vector<8x128xf32>
    %41 = arith.addf %37, %40 : vector<8x128xf32>
    %42 = math.tanh %41 : vector<8x128xf32>
    %cst_22 = arith.constant 1.000000e+00 : f32
    %43 = vector.broadcast %cst_22 : f32 to vector<8x128xf32>
    %44 = arith.subf %43, %36 : vector<8x128xf32>
    %45 = arith.mulf %44, %42 : vector<8x128xf32>
    %46 = arith.mulf %36, %15 : vector<8x128xf32>
    %47 = arith.addf %45, %46 : vector<8x128xf32>
    %c1_i32 = arith.constant 1 : i32
    %48 = arith.index_cast %c1_i32 : i32 to index
    %c0_23 = arith.constant 0 : index
    %c0_24 = arith.constant 0 : index
    %49 = vector.load %arg9[%48, %c0_23, %c0_24] : memref<8x8x384xf32, #tpu.memory_space<vmem>>, vector<1x8x384xf32>
    %50 = vector.shape_cast %49 : vector<1x8x384xf32> to vector<8x384xf32>
    %c0_25 = arith.constant 0 : index
    %c0_26 = arith.constant 0 : index
    %51 = vector.load %arg3[%c0_25, %c0_26] : memref<128x384xf32, #tpu.memory_space<vmem>>, vector<128x384xf32>
    %cst_27 = arith.constant dense<0.000000e+00> : vector<8x384xf32>
    %52 = tpu.matmul %47, %51, %cst_27 {dimension_numbers = #tpu.dot_dimension_numbers<[1], [0], [0], [1], [0, 0, 1, 1], [], []>} : vector<8x128xf32>, vector<128x384xf32>, vector<8x384xf32> -> vector<8x384xf32>
    %53 = vector.extract_strided_slice %50 {offsets = [0, 0], sizes = [8, 128], strides = [1, 1]} : vector<8x384xf32> to vector<8x128xf32>
    %54 = vector.extract_strided_slice %52 {offsets = [0, 0], sizes = [8, 128], strides = [1, 1]} : vector<8x384xf32> to vector<8x128xf32>
    %55 = arith.addf %53, %54 : vector<8x128xf32>
    %56 = arith.negf %55 : vector<8x128xf32>
    %57 = math.exp %56 : vector<8x128xf32>
    %cst_28 = arith.constant 1.000000e+00 : f32
    %58 = vector.broadcast %cst_28 : f32 to vector<8x128xf32>
    %59 = arith.addf %58, %57 : vector<8x128xf32>
    %60 = arith.divf %58, %59 : vector<8x128xf32>
    %61 = vector.extract_strided_slice %50 {offsets = [0, 128], sizes = [8, 128], strides = [1, 1]} : vector<8x384xf32> to vector<8x128xf32>
    %62 = vector.extract_strided_slice %52 {offsets = [0, 128], sizes = [8, 128], strides = [1, 1]} : vector<8x384xf32> to vector<8x128xf32>
    %63 = arith.addf %61, %62 : vector<8x128xf32>
    %64 = arith.negf %63 : vector<8x128xf32>
    %65 = math.exp %64 : vector<8x128xf32>
    %cst_29 = arith.constant 1.000000e+00 : f32
    %66 = vector.broadcast %cst_29 : f32 to vector<8x128xf32>
    %67 = arith.addf %66, %65 : vector<8x128xf32>
    %68 = arith.divf %66, %67 : vector<8x128xf32>
    %69 = vector.extract_strided_slice %50 {offsets = [0, 256], sizes = [8, 128], strides = [1, 1]} : vector<8x384xf32> to vector<8x128xf32>
    %70 = vector.extract_strided_slice %52 {offsets = [0, 256], sizes = [8, 128], strides = [1, 1]} : vector<8x384xf32> to vector<8x128xf32>
    %71 = arith.addf %70, %14 : vector<8x128xf32>
    %72 = arith.mulf %60, %71 : vector<8x128xf32>
    %73 = arith.addf %69, %72 : vector<8x128xf32>
    %74 = math.tanh %73 : vector<8x128xf32>
    %cst_30 = arith.constant 1.000000e+00 : f32
    %75 = vector.broadcast %cst_30 : f32 to vector<8x128xf32>
    %76 = arith.subf %75, %68 : vector<8x128xf32>
    %77 = arith.mulf %76, %74 : vector<8x128xf32>
    %78 = arith.mulf %68, %47 : vector<8x128xf32>
    %79 = arith.addf %77, %78 : vector<8x128xf32>
    %c2_i32 = arith.constant 2 : i32
    %80 = arith.index_cast %c2_i32 : i32 to index
    %c0_31 = arith.constant 0 : index
    %c0_32 = arith.constant 0 : index
    %81 = vector.load %arg9[%80, %c0_31, %c0_32] : memref<8x8x384xf32, #tpu.memory_space<vmem>>, vector<1x8x384xf32>
    %82 = vector.shape_cast %81 : vector<1x8x384xf32> to vector<8x384xf32>
    %c0_33 = arith.constant 0 : index
    %c0_34 = arith.constant 0 : index
    %83 = vector.load %arg3[%c0_33, %c0_34] : memref<128x384xf32, #tpu.memory_space<vmem>>, vector<128x384xf32>
    %cst_35 = arith.constant dense<0.000000e+00> : vector<8x384xf32>
    %84 = tpu.matmul %79, %83, %cst_35 {dimension_numbers = #tpu.dot_dimension_numbers<[1], [0], [0], [1], [0, 0, 1, 1], [], []>} : vector<8x128xf32>, vector<128x384xf32>, vector<8x384xf32> -> vector<8x384xf32>
    %85 = vector.extract_strided_slice %82 {offsets = [0, 0], sizes = [8, 128], strides = [1, 1]} : vector<8x384xf32> to vector<8x128xf32>
    %86 = vector.extract_strided_slice %84 {offsets = [0, 0], sizes = [8, 128], strides = [1, 1]} : vector<8x384xf32> to vector<8x128xf32>
    %87 = arith.addf %85, %86 : vector<8x128xf32>
    %88 = arith.negf %87 : vector<8x128xf32>
    %89 = math.exp %88 : vector<8x128xf32>
    %cst_36 = arith.constant 1.000000e+00 : f32
    %90 = vector.broadcast %cst_36 : f32 to vector<8x128xf32>
    %91 = arith.addf %90, %89 : vector<8x128xf32>
    %92 = arith.divf %90, %91 : vector<8x128xf32>
    %93 = vector.extract_strided_slice %82 {offsets = [0, 128], sizes = [8, 128], strides = [1, 1]} : vector<8x384xf32> to vector<8x128xf32>
    %94 = vector.extract_strided_slice %84 {offsets = [0, 128], sizes = [8, 128], strides = [1, 1]} : vector<8x384xf32> to vector<8x128xf32>
    %95 = arith.addf %93, %94 : vector<8x128xf32>
    %96 = arith.negf %95 : vector<8x128xf32>
    %97 = math.exp %96 : vector<8x128xf32>
    %cst_37 = arith.constant 1.000000e+00 : f32
    %98 = vector.broadcast %cst_37 : f32 to vector<8x128xf32>
    %99 = arith.addf %98, %97 : vector<8x128xf32>
    %100 = arith.divf %98, %99 : vector<8x128xf32>
    %101 = vector.extract_strided_slice %82 {offsets = [0, 256], sizes = [8, 128], strides = [1, 1]} : vector<8x384xf32> to vector<8x128xf32>
    %102 = vector.extract_strided_slice %84 {offsets = [0, 256], sizes = [8, 128], strides = [1, 1]} : vector<8x384xf32> to vector<8x128xf32>
    %103 = arith.addf %102, %14 : vector<8x128xf32>
    %104 = arith.mulf %92, %103 : vector<8x128xf32>
    %105 = arith.addf %101, %104 : vector<8x128xf32>
    %106 = math.tanh %105 : vector<8x128xf32>
    %cst_38 = arith.constant 1.000000e+00 : f32
    %107 = vector.broadcast %cst_38 : f32 to vector<8x128xf32>
    %108 = arith.subf %107, %100 : vector<8x128xf32>
    %109 = arith.mulf %108, %106 : vector<8x128xf32>
    %110 = arith.mulf %100, %79 : vector<8x128xf32>
    %111 = arith.addf %109, %110 : vector<8x128xf32>
    %c3_i32 = arith.constant 3 : i32
    %112 = arith.index_cast %c3_i32 : i32 to index
    %c0_39 = arith.constant 0 : index
    %c0_40 = arith.constant 0 : index
    %113 = vector.load %arg9[%112, %c0_39, %c0_40] : memref<8x8x384xf32, #tpu.memory_space<vmem>>, vector<1x8x384xf32>
    %114 = vector.shape_cast %113 : vector<1x8x384xf32> to vector<8x384xf32>
    %c0_41 = arith.constant 0 : index
    %c0_42 = arith.constant 0 : index
    %115 = vector.load %arg3[%c0_41, %c0_42] : memref<128x384xf32, #tpu.memory_space<vmem>>, vector<128x384xf32>
    %cst_43 = arith.constant dense<0.000000e+00> : vector<8x384xf32>
    %116 = tpu.matmul %111, %115, %cst_43 {dimension_numbers = #tpu.dot_dimension_numbers<[1], [0], [0], [1], [0, 0, 1, 1], [], []>} : vector<8x128xf32>, vector<128x384xf32>, vector<8x384xf32> -> vector<8x384xf32>
    %117 = vector.extract_strided_slice %114 {offsets = [0, 0], sizes = [8, 128], strides = [1, 1]} : vector<8x384xf32> to vector<8x128xf32>
    %118 = vector.extract_strided_slice %116 {offsets = [0, 0], sizes = [8, 128], strides = [1, 1]} : vector<8x384xf32> to vector<8x128xf32>
    %119 = arith.addf %117, %118 : vector<8x128xf32>
    %120 = arith.negf %119 : vector<8x128xf32>
    %121 = math.exp %120 : vector<8x128xf32>
    %cst_44 = arith.constant 1.000000e+00 : f32
    %122 = vector.broadcast %cst_44 : f32 to vector<8x128xf32>
    %123 = arith.addf %122, %121 : vector<8x128xf32>
    %124 = arith.divf %122, %123 : vector<8x128xf32>
    %125 = vector.extract_strided_slice %114 {offsets = [0, 128], sizes = [8, 128], strides = [1, 1]} : vector<8x384xf32> to vector<8x128xf32>
    %126 = vector.extract_strided_slice %116 {offsets = [0, 128], sizes = [8, 128], strides = [1, 1]} : vector<8x384xf32> to vector<8x128xf32>
    %127 = arith.addf %125, %126 : vector<8x128xf32>
    %128 = arith.negf %127 : vector<8x128xf32>
    %129 = math.exp %128 : vector<8x128xf32>
    %cst_45 = arith.constant 1.000000e+00 : f32
    %130 = vector.broadcast %cst_45 : f32 to vector<8x128xf32>
    %131 = arith.addf %130, %129 : vector<8x128xf32>
    %132 = arith.divf %130, %131 : vector<8x128xf32>
    %133 = vector.extract_strided_slice %114 {offsets = [0, 256], sizes = [8, 128], strides = [1, 1]} : vector<8x384xf32> to vector<8x128xf32>
    %134 = vector.extract_strided_slice %116 {offsets = [0, 256], sizes = [8, 128], strides = [1, 1]} : vector<8x384xf32> to vector<8x128xf32>
    %135 = arith.addf %134, %14 : vector<8x128xf32>
    %136 = arith.mulf %124, %135 : vector<8x128xf32>
    %137 = arith.addf %133, %136 : vector<8x128xf32>
    %138 = math.tanh %137 : vector<8x128xf32>
    %cst_46 = arith.constant 1.000000e+00 : f32
    %139 = vector.broadcast %cst_46 : f32 to vector<8x128xf32>
    %140 = arith.subf %139, %132 : vector<8x128xf32>
    %141 = arith.mulf %140, %138 : vector<8x128xf32>
    %142 = arith.mulf %132, %111 : vector<8x128xf32>
    %143 = arith.addf %141, %142 : vector<8x128xf32>
    %c4_i32 = arith.constant 4 : i32
    %144 = arith.index_cast %c4_i32 : i32 to index
    %c0_47 = arith.constant 0 : index
    %c0_48 = arith.constant 0 : index
    %145 = vector.load %arg9[%144, %c0_47, %c0_48] : memref<8x8x384xf32, #tpu.memory_space<vmem>>, vector<1x8x384xf32>
    %146 = vector.shape_cast %145 : vector<1x8x384xf32> to vector<8x384xf32>
    %c0_49 = arith.constant 0 : index
    %c0_50 = arith.constant 0 : index
    %147 = vector.load %arg3[%c0_49, %c0_50] : memref<128x384xf32, #tpu.memory_space<vmem>>, vector<128x384xf32>
    %cst_51 = arith.constant dense<0.000000e+00> : vector<8x384xf32>
    %148 = tpu.matmul %143, %147, %cst_51 {dimension_numbers = #tpu.dot_dimension_numbers<[1], [0], [0], [1], [0, 0, 1, 1], [], []>} : vector<8x128xf32>, vector<128x384xf32>, vector<8x384xf32> -> vector<8x384xf32>
    %149 = vector.extract_strided_slice %146 {offsets = [0, 0], sizes = [8, 128], strides = [1, 1]} : vector<8x384xf32> to vector<8x128xf32>
    %150 = vector.extract_strided_slice %148 {offsets = [0, 0], sizes = [8, 128], strides = [1, 1]} : vector<8x384xf32> to vector<8x128xf32>
    %151 = arith.addf %149, %150 : vector<8x128xf32>
    %152 = arith.negf %151 : vector<8x128xf32>
    %153 = math.exp %152 : vector<8x128xf32>
    %cst_52 = arith.constant 1.000000e+00 : f32
    %154 = vector.broadcast %cst_52 : f32 to vector<8x128xf32>
    %155 = arith.addf %154, %153 : vector<8x128xf32>
    %156 = arith.divf %154, %155 : vector<8x128xf32>
    %157 = vector.extract_strided_slice %146 {offsets = [0, 128], sizes = [8, 128], strides = [1, 1]} : vector<8x384xf32> to vector<8x128xf32>
    %158 = vector.extract_strided_slice %148 {offsets = [0, 128], sizes = [8, 128], strides = [1, 1]} : vector<8x384xf32> to vector<8x128xf32>
    %159 = arith.addf %157, %158 : vector<8x128xf32>
    %160 = arith.negf %159 : vector<8x128xf32>
    %161 = math.exp %160 : vector<8x128xf32>
    %cst_53 = arith.constant 1.000000e+00 : f32
    %162 = vector.broadcast %cst_53 : f32 to vector<8x128xf32>
    %163 = arith.addf %162, %161 : vector<8x128xf32>
    %164 = arith.divf %162, %163 : vector<8x128xf32>
    %165 = vector.extract_strided_slice %146 {offsets = [0, 256], sizes = [8, 128], strides = [1, 1]} : vector<8x384xf32> to vector<8x128xf32>
    %166 = vector.extract_strided_slice %148 {offsets = [0, 256], sizes = [8, 128], strides = [1, 1]} : vector<8x384xf32> to vector<8x128xf32>
    %167 = arith.addf %166, %14 : vector<8x128xf32>
    %168 = arith.mulf %156, %167 : vector<8x128xf32>
    %169 = arith.addf %165, %168 : vector<8x128xf32>
    %170 = math.tanh %169 : vector<8x128xf32>
    %cst_54 = arith.constant 1.000000e+00 : f32
    %171 = vector.broadcast %cst_54 : f32 to vector<8x128xf32>
    %172 = arith.subf %171, %164 : vector<8x128xf32>
    %173 = arith.mulf %172, %170 : vector<8x128xf32>
    %174 = arith.mulf %164, %143 : vector<8x128xf32>
    %175 = arith.addf %173, %174 : vector<8x128xf32>
    %c5_i32 = arith.constant 5 : i32
    %176 = arith.index_cast %c5_i32 : i32 to index
    %c0_55 = arith.constant 0 : index
    %c0_56 = arith.constant 0 : index
    %177 = vector.load %arg9[%176, %c0_55, %c0_56] : memref<8x8x384xf32, #tpu.memory_space<vmem>>, vector<1x8x384xf32>
    %178 = vector.shape_cast %177 : vector<1x8x384xf32> to vector<8x384xf32>
    %c0_57 = arith.constant 0 : index
    %c0_58 = arith.constant 0 : index
    %179 = vector.load %arg3[%c0_57, %c0_58] : memref<128x384xf32, #tpu.memory_space<vmem>>, vector<128x384xf32>
    %cst_59 = arith.constant dense<0.000000e+00> : vector<8x384xf32>
    %180 = tpu.matmul %175, %179, %cst_59 {dimension_numbers = #tpu.dot_dimension_numbers<[1], [0], [0], [1], [0, 0, 1, 1], [], []>} : vector<8x128xf32>, vector<128x384xf32>, vector<8x384xf32> -> vector<8x384xf32>
    %181 = vector.extract_strided_slice %178 {offsets = [0, 0], sizes = [8, 128], strides = [1, 1]} : vector<8x384xf32> to vector<8x128xf32>
    %182 = vector.extract_strided_slice %180 {offsets = [0, 0], sizes = [8, 128], strides = [1, 1]} : vector<8x384xf32> to vector<8x128xf32>
    %183 = arith.addf %181, %182 : vector<8x128xf32>
    %184 = arith.negf %183 : vector<8x128xf32>
    %185 = math.exp %184 : vector<8x128xf32>
    %cst_60 = arith.constant 1.000000e+00 : f32
    %186 = vector.broadcast %cst_60 : f32 to vector<8x128xf32>
    %187 = arith.addf %186, %185 : vector<8x128xf32>
    %188 = arith.divf %186, %187 : vector<8x128xf32>
    %189 = vector.extract_strided_slice %178 {offsets = [0, 128], sizes = [8, 128], strides = [1, 1]} : vector<8x384xf32> to vector<8x128xf32>
    %190 = vector.extract_strided_slice %180 {offsets = [0, 128], sizes = [8, 128], strides = [1, 1]} : vector<8x384xf32> to vector<8x128xf32>
    %191 = arith.addf %189, %190 : vector<8x128xf32>
    %192 = arith.negf %191 : vector<8x128xf32>
    %193 = math.exp %192 : vector<8x128xf32>
    %cst_61 = arith.constant 1.000000e+00 : f32
    %194 = vector.broadcast %cst_61 : f32 to vector<8x128xf32>
    %195 = arith.addf %194, %193 : vector<8x128xf32>
    %196 = arith.divf %194, %195 : vector<8x128xf32>
    %197 = vector.extract_strided_slice %178 {offsets = [0, 256], sizes = [8, 128], strides = [1, 1]} : vector<8x384xf32> to vector<8x128xf32>
    %198 = vector.extract_strided_slice %180 {offsets = [0, 256], sizes = [8, 128], strides = [1, 1]} : vector<8x384xf32> to vector<8x128xf32>
    %199 = arith.addf %198, %14 : vector<8x128xf32>
    %200 = arith.mulf %188, %199 : vector<8x128xf32>
    %201 = arith.addf %197, %200 : vector<8x128xf32>
    %202 = math.tanh %201 : vector<8x128xf32>
    %cst_62 = arith.constant 1.000000e+00 : f32
    %203 = vector.broadcast %cst_62 : f32 to vector<8x128xf32>
    %204 = arith.subf %203, %196 : vector<8x128xf32>
    %205 = arith.mulf %204, %202 : vector<8x128xf32>
    %206 = arith.mulf %196, %175 : vector<8x128xf32>
    %207 = arith.addf %205, %206 : vector<8x128xf32>
    %c6_i32 = arith.constant 6 : i32
    %208 = arith.index_cast %c6_i32 : i32 to index
    %c0_63 = arith.constant 0 : index
    %c0_64 = arith.constant 0 : index
    %209 = vector.load %arg9[%208, %c0_63, %c0_64] : memref<8x8x384xf32, #tpu.memory_space<vmem>>, vector<1x8x384xf32>
    %210 = vector.shape_cast %209 : vector<1x8x384xf32> to vector<8x384xf32>
    %c0_65 = arith.constant 0 : index
    %c0_66 = arith.constant 0 : index
    %211 = vector.load %arg3[%c0_65, %c0_66] : memref<128x384xf32, #tpu.memory_space<vmem>>, vector<128x384xf32>
    %cst_67 = arith.constant dense<0.000000e+00> : vector<8x384xf32>
    %212 = tpu.matmul %207, %211, %cst_67 {dimension_numbers = #tpu.dot_dimension_numbers<[1], [0], [0], [1], [0, 0, 1, 1], [], []>} : vector<8x128xf32>, vector<128x384xf32>, vector<8x384xf32> -> vector<8x384xf32>
    %213 = vector.extract_strided_slice %210 {offsets = [0, 0], sizes = [8, 128], strides = [1, 1]} : vector<8x384xf32> to vector<8x128xf32>
    %214 = vector.extract_strided_slice %212 {offsets = [0, 0], sizes = [8, 128], strides = [1, 1]} : vector<8x384xf32> to vector<8x128xf32>
    %215 = arith.addf %213, %214 : vector<8x128xf32>
    %216 = arith.negf %215 : vector<8x128xf32>
    %217 = math.exp %216 : vector<8x128xf32>
    %cst_68 = arith.constant 1.000000e+00 : f32
    %218 = vector.broadcast %cst_68 : f32 to vector<8x128xf32>
    %219 = arith.addf %218, %217 : vector<8x128xf32>
    %220 = arith.divf %218, %219 : vector<8x128xf32>
    %221 = vector.extract_strided_slice %210 {offsets = [0, 128], sizes = [8, 128], strides = [1, 1]} : vector<8x384xf32> to vector<8x128xf32>
    %222 = vector.extract_strided_slice %212 {offsets = [0, 128], sizes = [8, 128], strides = [1, 1]} : vector<8x384xf32> to vector<8x128xf32>
    %223 = arith.addf %221, %222 : vector<8x128xf32>
    %224 = arith.negf %223 : vector<8x128xf32>
    %225 = math.exp %224 : vector<8x128xf32>
    %cst_69 = arith.constant 1.000000e+00 : f32
    %226 = vector.broadcast %cst_69 : f32 to vector<8x128xf32>
    %227 = arith.addf %226, %225 : vector<8x128xf32>
    %228 = arith.divf %226, %227 : vector<8x128xf32>
    %229 = vector.extract_strided_slice %210 {offsets = [0, 256], sizes = [8, 128], strides = [1, 1]} : vector<8x384xf32> to vector<8x128xf32>
    %230 = vector.extract_strided_slice %212 {offsets = [0, 256], sizes = [8, 128], strides = [1, 1]} : vector<8x384xf32> to vector<8x128xf32>
    %231 = arith.addf %230, %14 : vector<8x128xf32>
    %232 = arith.mulf %220, %231 : vector<8x128xf32>
    %233 = arith.addf %229, %232 : vector<8x128xf32>
    %234 = math.tanh %233 : vector<8x128xf32>
    %cst_70 = arith.constant 1.000000e+00 : f32
    %235 = vector.broadcast %cst_70 : f32 to vector<8x128xf32>
    %236 = arith.subf %235, %228 : vector<8x128xf32>
    %237 = arith.mulf %236, %234 : vector<8x128xf32>
    %238 = arith.mulf %228, %207 : vector<8x128xf32>
    %239 = arith.addf %237, %238 : vector<8x128xf32>
    %c7_i32 = arith.constant 7 : i32
    %240 = arith.index_cast %c7_i32 : i32 to index
    %c0_71 = arith.constant 0 : index
    %c0_72 = arith.constant 0 : index
    %241 = vector.load %arg9[%240, %c0_71, %c0_72] : memref<8x8x384xf32, #tpu.memory_space<vmem>>, vector<1x8x384xf32>
    %242 = vector.shape_cast %241 : vector<1x8x384xf32> to vector<8x384xf32>
    %c0_73 = arith.constant 0 : index
    %c0_74 = arith.constant 0 : index
    %243 = vector.load %arg3[%c0_73, %c0_74] : memref<128x384xf32, #tpu.memory_space<vmem>>, vector<128x384xf32>
    %cst_75 = arith.constant dense<0.000000e+00> : vector<8x384xf32>
    %244 = tpu.matmul %239, %243, %cst_75 {dimension_numbers = #tpu.dot_dimension_numbers<[1], [0], [0], [1], [0, 0, 1, 1], [], []>} : vector<8x128xf32>, vector<128x384xf32>, vector<8x384xf32> -> vector<8x384xf32>
    %245 = vector.extract_strided_slice %242 {offsets = [0, 0], sizes = [8, 128], strides = [1, 1]} : vector<8x384xf32> to vector<8x128xf32>
    %246 = vector.extract_strided_slice %244 {offsets = [0, 0], sizes = [8, 128], strides = [1, 1]} : vector<8x384xf32> to vector<8x128xf32>
    %247 = arith.addf %245, %246 : vector<8x128xf32>
    %248 = arith.negf %247 : vector<8x128xf32>
    %249 = math.exp %248 : vector<8x128xf32>
    %cst_76 = arith.constant 1.000000e+00 : f32
    %250 = vector.broadcast %cst_76 : f32 to vector<8x128xf32>
    %251 = arith.addf %250, %249 : vector<8x128xf32>
    %252 = arith.divf %250, %251 : vector<8x128xf32>
    %253 = vector.extract_strided_slice %242 {offsets = [0, 128], sizes = [8, 128], strides = [1, 1]} : vector<8x384xf32> to vector<8x128xf32>
    %254 = vector.extract_strided_slice %244 {offsets = [0, 128], sizes = [8, 128], strides = [1, 1]} : vector<8x384xf32> to vector<8x128xf32>
    %255 = arith.addf %253, %254 : vector<8x128xf32>
    %256 = arith.negf %255 : vector<8x128xf32>
    %257 = math.exp %256 : vector<8x128xf32>
    %cst_77 = arith.constant 1.000000e+00 : f32
    %258 = vector.broadcast %cst_77 : f32 to vector<8x128xf32>
    %259 = arith.addf %258, %257 : vector<8x128xf32>
    %260 = arith.divf %258, %259 : vector<8x128xf32>
    %261 = vector.extract_strided_slice %242 {offsets = [0, 256], sizes = [8, 128], strides = [1, 1]} : vector<8x384xf32> to vector<8x128xf32>
    %262 = vector.extract_strided_slice %244 {offsets = [0, 256], sizes = [8, 128], strides = [1, 1]} : vector<8x384xf32> to vector<8x128xf32>
    %263 = arith.addf %262, %14 : vector<8x128xf32>
    %264 = arith.mulf %252, %263 : vector<8x128xf32>
    %265 = arith.addf %261, %264 : vector<8x128xf32>
    %266 = math.tanh %265 : vector<8x128xf32>
    %cst_78 = arith.constant 1.000000e+00 : f32
    %267 = vector.broadcast %cst_78 : f32 to vector<8x128xf32>
    %268 = arith.subf %267, %260 : vector<8x128xf32>
    %269 = arith.mulf %268, %266 : vector<8x128xf32>
    %270 = arith.mulf %260, %239 : vector<8x128xf32>
    %271 = arith.addf %269, %270 : vector<8x128xf32>
    %c8_i32 = arith.constant 8 : i32
    %c0_79 = arith.constant 0 : index
    %c0_80 = arith.constant 0 : index
    %272 = vector.load %arg10[%c0_79, %c0_80] : memref<8x128xf32, #tpu.memory_space<vmem>>, vector<8x128xf32>
    tpu.vector_store %arg10[%c0_79, %c0_80], %271 {strides = array<i32>} : memref<8x128xf32, #tpu.memory_space<vmem>>, vector<8x128xf32>,
    %c0_i32_81 = arith.constant 0 : i32
    %273 = arith.cmpi eq, %arg0, %c0_i32_81 : i32
    %274 = arith.extui %273 : i1 to i32
    %c0_i32_82 = arith.constant 0 : i32
    %275 = arith.cmpi ne, %274, %c0_i32_82 : i32
    scf.if %275 {
      %c0_83 = arith.constant 0 : index
      %c0_84 = arith.constant 0 : index
      %276 = vector.load %arg10[%c0_83, %c0_84] : memref<8x128xf32, #tpu.memory_space<vmem>>, vector<8x128xf32>
      %c0_85 = arith.constant 0 : index
      %c0_86 = arith.constant 0 : index
      %277 = vector.load %arg6[%c0_85, %c0_86] : memref<128x128xf32, #tpu.memory_space<vmem>>, vector<128x128xf32>
      %cst_87 = arith.constant dense<0.000000e+00> : vector<8x128xf32>
      %278 = tpu.matmul %276, %277, %cst_87 {dimension_numbers = #tpu.dot_dimension_numbers<[1], [0], [0], [1], [0, 0, 1, 1], [], []>} : vector<8x128xf32>, vector<128x128xf32>, vector<8x128xf32> -> vector<8x128xf32>
      %c0_88 = arith.constant 0 : index
      %c0_89 = arith.constant 0 : index
      %279 = vector.load %arg7[%c0_88, %c0_89] : memref<1x128xf32, #tpu.memory_space<vmem>>, vector<1x128xf32>
      %280 = vector.broadcast %279 : vector<1x128xf32> to vector<8x128xf32>
      %281 = arith.addf %278, %280 : vector<8x128xf32>
      %c0_90 = arith.constant 0 : index
      %c0_91 = arith.constant 0 : index
      %282 = vector.load %arg8[%c0_90, %c0_91] : memref<8x128xf32, #tpu.memory_space<vmem>>, vector<8x128xf32>
      tpu.vector_store %arg8[%c0_90, %c0_91], %281 {strides = array<i32>} : memref<8x128xf32, #tpu.memory_space<vmem>>, vector<8x128xf32>,
    } else {
    }
    return
  }
  func.func @transform_0(%arg0: i32) -> (i32, i32, i32) {
    %c0_i32 = arith.constant 0 : i32
    %c0_i32_0 = arith.constant 0 : i32
    %c0_i32_1 = arith.constant 0 : i32
    return %arg0, %c0_i32, %c0_i32_0 : i32, i32, i32
  }
  func.func @transform_1(%arg0: i32) -> (i32, i32) {
    %c0_i32 = arith.constant 0 : i32
    %c0_i32_0 = arith.constant 0 : i32
    %c0_i32_1 = arith.constant 0 : i32
    return %c0_i32, %c0_i32_0 : i32, i32
  }
  func.func @transform_2(%arg0: i32) -> (i32, i32) {
    %c0_i32 = arith.constant 0 : i32
    %c0_i32_0 = arith.constant 0 : i32
    %c0_i32_1 = arith.constant 0 : i32
    return %c0_i32, %c0_i32_0 : i32, i32
  }
  func.func @transform_3(%arg0: i32) -> (i32, i32) {
    %c0_i32 = arith.constant 0 : i32
    %c0_i32_0 = arith.constant 0 : i32
    %c0_i32_1 = arith.constant 0 : i32
    return %c0_i32, %c0_i32_0 : i32, i32
  }
  func.func @transform_4(%arg0: i32) -> (i32, i32) {
    %c0_i32 = arith.constant 0 : i32
    %c0_i32_0 = arith.constant 0 : i32
    %c0_i32_1 = arith.constant 0 : i32
    return %c0_i32, %c0_i32_0 : i32, i32
  }
  func.func @transform_5(%arg0: i32) -> (i32, i32) {
    %c0_i32 = arith.constant 0 : i32
    %c0_i32_0 = arith.constant 0 : i32
    %c0_i32_1 = arith.constant 0 : i32
    return %c0_i32, %c0_i32_0 : i32, i32
  }
  func.func @transform_6(%arg0: i32) -> (i32, i32) {
    %c0_i32 = arith.constant 0 : i32
    %c0_i32_0 = arith.constant 0 : i32
    %c0_i32_1 = arith.constant 0 : i32
    return %c0_i32, %c0_i32_0 : i32, i32
  }
  func.func @transform_7(%arg0: i32) -> (i32, i32) {
    %c0_i32 = arith.constant 0 : i32
    %c0_i32_0 = arith.constant 0 : i32
    %c0_i32_1 = arith.constant 0 : i32
    return %c0_i32, %c0_i32_0 : i32, i32
  }
}

</mosaic_0001>

<bundles_post_ra>
// kernel: gru_model_forward.1
= control target key start
LH: loop header
LB: loop body
LE: loop exit
PB: predicated region body
PF: predicated region fallthrough
CT: control target
= control target key end

     0   :  { %12 = vsyncpa [#allocation5], 0  ;;  %s3690_s0 = inlined_call_operand.vmem [shape: f32[8,8,128], index: 0, kind: input, shape index: {}]   ;;  %s3691_s1 = inlined_call_operand.hbm [shape: f32[128,384], index: 1, kind: input, shape index: {}]   ;;  %s3692_s2 = inlined_call_operand.hbm [shape: f32[128,384], index: 2, kind: input, shape index: {}]   ;;  %s3693_s3 = inlined_call_operand.vmem [shape: f32[1,384], index: 3, kind: input, shape index: {}]   ;;  %s3694_s4 = inlined_call_operand.vmem [shape: f32[1,128], index: 4, kind: input, shape index: {}]   ;;  %s3695_s5 = inlined_call_operand.vmem [shape: f32[128,128], index: 5, kind: input, shape index: {}]   ;;  %s3696_s6 = inlined_call_operand.vmem [shape: f32[1,128], index: 6, kind: input, shape index: {}]   ;;  %s3697_s7 = inlined_call_operand.vmem [shape: f32[8,128], index: 7, kind: output, shape index: {}]  }
   0x1   :  { %13 = vsyncpa [#allocation7], 0  ;;  %s3127_s24 = smov [#allocation4]   ;;  %s3079_s28 = scalar_lea.hbm %s3691_s1, 6144 }
   0x2   :  { %s21_s25 = sshll.u32 %s3127_s24, 4  ;;  %p3080_p0 = scmp.ne.s32.totalorder %s3691_s1, %s3079_s28  ;;  %s22_s25 = int_to_ptr.vmem [resolvable:$true] %s21_s25 }
   0x3   :  { %p3083_p1 = scmp.lt.u32.totalorder %s3079_s28, %s3691_s1 }
   0x5   :  { %p3085_p2 = pnand %p3083_p1, %p3080_p0 }
   0x7   :  { %3088 = shalt.err (!%p3085_p2)
}
   0x8   :  { %s3089_s10 = scalar_lea.vmem %s22_s25, 6144  ;;  %p3094_p4 = scmp.lt.s32.totalorder %s22_s25, %s22_s25 }
   0x9   :  { %p3090_p3 = scmp.ne.s32.totalorder %s22_s25, %s3089_s10  ;;  %p3095_p5 = scmp.lt.s32.totalorder %s3089_s10, %s3089_s10 }
   0xb   :  { %p3096_p6 = por %p3095_p5, %p3094_p4 }
   0xd   :  { %p3097_p7 = pnand %p3096_p6, %p3090_p3 }
   0xf   :  { %3100 = shalt.err (!%p3097_p7)
}
  0x10   :  { %s3128_s11 = smov 384   ;;  %s3129_s12 = smov 24  }
  0x11   :  { %27 = dma.hbm_to_vmem [thread:$0]  %s3691_s1, 6144, %s22_s25, [#allocation5], %s3128_s11, %s3128_s11, %s3129_s12  }
  0x12   :  { %s3130_s15 = smov [#allocation6]   ;;  %s3101_s19 = scalar_lea.hbm %s3692_s2, 6144 }
  0x13   :  { %s33_s16 = sshll.u32 %s3130_s15, 4  ;;  %p3102_p8 = scmp.ne.s32.totalorder %s3692_s2, %s3101_s19  ;;  %s34_s16 = int_to_ptr.vmem [resolvable:$true] %s33_s16 }
  0x14   :  { %p3105_p9 = scmp.lt.u32.totalorder %s3101_s19, %s3692_s2 }
  0x16   :  { %p3107_p10 = pnand %p3105_p9, %p3102_p8 }
  0x18   :  { %3110 = shalt.err (!%p3107_p10)
}
  0x19   :  { %s3111_s24 = scalar_lea.vmem %s34_s16, 6144  ;;  %p3116_p12 = scmp.lt.s32.totalorder %s34_s16, %s34_s16 }
  0x1a   :  { %p3112_p11 = scmp.ne.s32.totalorder %s34_s16, %s3111_s24  ;;  %p3117_p13 = scmp.lt.s32.totalorder %s3111_s24, %s3111_s24 }
  0x1c   :  { %p3118_p0 = por %p3117_p13, %p3116_p12 }
  0x1e   :  { %p3119_p1 = pnand %p3118_p0, %p3112_p11 }
  0x20   :  { %3122 = shalt.err (!%p3119_p1)
}
  0x21   :  { %39 = dma.hbm_to_vmem [thread:$0]  %s3692_s2, 6144, %s34_s16, [#allocation7], %s3128_s11, %s3128_s11, %s3129_s12  }
  0x22   :  { %3123 = dma.done.wait [#allocation5], 6144  }
  0x23   :  { %3124 = vsyncadd [#allocation5], 4294961152 }
  0x24   :  { %3125 = dma.done.wait [#allocation7], 6144  }
  0x25   :  { %3126 = vsyncadd [#allocation7], 4294961152  ;;  %v3131_v0 = vmov 0.0   ;;  %v68_v1 = vld [vmem:[#allocation4 + $0x8] sm:$0xff]  ;;  %v71_v2 = vld [vmem:[#allocation4 + $0x20] sm:$0xff]  ;;  %vm3133_vm0 = vmmov 0  }
  0x26   :  { %196 = vmatprep.mubr.f32.mxu0 %v3131_v0  ;;  %v67_v3 = vld [vmem:[#allocation4] sm:$0xff]  ;;  %v2424_v4 = vpack.c.bf16 %v71_v2, %v68_v1  ;;  %v70_v5 = vld [vmem:[#allocation4 + $0x18] sm:$0xff]  ;;  %v77_v7 = vld [vmem:[#allocation4 + $0x50] sm:$0xff] }
  0x27   :  { %v74_v6 = vld [vmem:[#allocation4 + $0x38] sm:$0xff]  ;;  %v2426_v8 = vpack.c.bf16 %v70_v5, %v67_v3  ;;  %v73_v10 = vld [vmem:[#allocation4 + $0x30] sm:$0xff]  ;;  %v76_v11 = vld [vmem:[#allocation4 + $0x48] sm:$0xff] }
  0x28   :  { %v2428_v9 = vpack.c.bf16 %v77_v7, %v74_v6  ;;  %v80_v12 = vld [vmem:[#allocation4 + $0x68] sm:$0xff]  ;;  %2425 = vmatprep.subr.bf16.mxu0 %v2424_v4  ;;  %v83_v13 = vld [vmem:[#allocation4 + $0x80] sm:$0xff]  ;;  %v2430_v14 = vpack.c.bf16 %v76_v11, %v73_v10  ;;  %v82_v17 = vld [vmem:[#allocation4 + $0x78] sm:$0xff] }
  0x29   :  { %2427 = vmatpush1.bf16.msra.mxu0 %v2426_v8  ;;  %v2432_v15 = vpack.c.bf16 %v83_v13, %v80_v12  ;;  %v79_v16 = vld [vmem:[#allocation4 + $0x60] sm:$0xff]  ;;  %v86_v18 = vld [vmem:[#allocation4 + $0x98] sm:$0xff]  ;;  %v89_v19 = vld [vmem:[#allocation4 + $0xb0] sm:$0xff] }
  0x2a   :  { %2429 = vmatprep.subr.bf16.mxu0 %v2428_v9  ;;  %v2434_v20 = vpack.c.bf16 %v82_v17, %v79_v16  ;;  %v85_v21 = vld [vmem:[#allocation4 + $0x90] sm:$0xff]  ;;  %v2436_v22 = vpack.c.bf16 %v89_v19, %v86_v18  ;;  %v88_v23 = vld [vmem:[#allocation4 + $0xa8] sm:$0xff]  ;;  %v95_v27 = vld [vmem:[#allocation4 + $0xe0] sm:$0xff] }
  0x2b   :  { %v69_v24 = vld [vmem:[#allocation4 + $0x10] sm:$0xff]  ;;  %v72_v25 = vld [vmem:[#allocation4 + $0x28] sm:$0xff]  ;;  %v75_v29 = vld [vmem:[#allocation4 + $0x40] sm:$0xff]  ;;  %v2438_v31 = vpack.c.bf16 %v88_v23, %v85_v21 }
  0x2c   :  { %v92_v26 = vld [vmem:[#allocation4 + $0xc8] sm:$0xff]  ;;  %v2456_v28 = vpack.c.bf16 %v72_v25, %v69_v24  ;;  %v78_v30 = vld [vmem:[#allocation4 + $0x58] sm:$0xff]  ;;  %v91_v32 = vld [vmem:[#allocation4 + $0xc0] sm:$0xff] }
  0x2d   :  { %2431 = vmatpush1.bf16.msra.mxu0 %v2430_v14  ;;  %v2460_v33 = vpack.c.bf16 %v78_v30, %v75_v29  ;;  %v2440_v34 = vpack.c.bf16 %v95_v27, %v92_v26  ;;  %v94_v35 = vld [vmem:[#allocation4 + $0xd8] sm:$0xff]  ;;  %v3202_v36 = vld [vmem:[%s3690_s0] sm:$0xff]  ;;  %v81_v37 = vld [vmem:[#allocation4 + $0x70] sm:$0xff] }
  0x2e   :  { %2433 = vmatprep.subr.bf16.mxu0 %v2432_v15  ;;  %2457 = vmatprep.subr.bf16.mxu1 %v2456_v28  ;;  %v98_v38 = vld [vmem:[#allocation4 + $0xf8] sm:$0xff]  ;;  %v101_v39 = vld [vmem:[#allocation4 + $0x110] sm:$0xff]  ;;  %v84_v40 = vld [vmem:[#allocation4 + $0x88] sm:$0xff]  ;;  %v2442_v42 = vpack.c.bf16 %v94_v35, %v91_v32 }
  0x2f   :  { %2459 = vmatpush3.bf16.msra.mxu1 %v2456_v28  ;;  %2097 = vmatprep.mubr.f32.mxu1 %v3202_v36  ;;  %v2464_v41 = vpack.c.bf16 %v84_v40, %v81_v37  ;;  %v87_v43 = vld [vmem:[#allocation4 + $0xa0] sm:$0xff]  ;;  %v90_v44 = vld [vmem:[#allocation4 + $0xb8] sm:$0xff]  ;;  %v2444_v45 = vpack.c.bf16 %v101_v39, %v98_v38  ;;  %v97_v46 = vld [vmem:[#allocation4 + $0xf0] sm:$0xff]  ;;  %v3132_v40 = vmov 0.0|0.0  }
  0x30   :  { %2461 = vmatprep.subr.bf16.mxu1 %v2460_v33  ;;  %v100_v47 = vld [vmem:[#allocation4 + $0x108] sm:$0xff]  ;;  %v107_v49 = vld [vmem:[#allocation4 + $0x140] sm:$0xff]  ;;  %v2468_v50 = vpack.c.bf16 %v90_v44, %v87_v43  ;;  %v93_v51 = vld [vmem:[#allocation4 + $0xd0] sm:$0xff] }
  0x31   :  { %2435 = vmatpush1.bf16.msra.mxu0 %v2434_v20  ;;  %v104_v48 = vld [vmem:[#allocation4 + $0x128] sm:$0xff]  ;;  %v2446_v53 = vpack.c.bf16 %v100_v47, %v97_v46  ;;  %v103_v55 = vld [vmem:[#allocation4 + $0x120] sm:$0xff]  ;;  %v106_v56 = vld [vmem:[#allocation4 + $0x138] sm:$0xff] }
  0x32   :  { %2437 = vmatprep.subr.bf16.mxu0 %v2436_v22  ;;  %v96_v52 = vld [vmem:[#allocation4 + $0xe8] sm:$0xff]  ;;  %v2448_v54 = vpack.c.bf16 %v107_v49, %v104_v48  ;;  %v110_v57 = vld [vmem:[#allocation4 + $0x158] sm:$0xff]  ;;  %v113_v58 = vld [vmem:[#allocation4 + $0x170] sm:$0xff]  ;;  %v2450_v62 = vpack.c.bf16 %v106_v56, %v103_v55 }
  0x33   :  { %2463 = vmatpush3.bf16.msra.mxu1 %v2460_v33  ;;  %v2472_v59 = vpack.c.bf16 %v96_v52, %v93_v51  ;;  %v99_v60 = vld [vmem:[#allocation4 + $0x100] sm:$0xff]  ;;  %v102_v61 = vld [vmem:[#allocation4 + $0x118] sm:$0xff]  ;;  %v2452_v63 = vpack.c.bf16 %v113_v58, %v110_v57  ;;  %v109_v1 = vld [vmem:[#allocation4 + $0x150] sm:$0xff] }
  0x34   :  { %2465 = vmatprep.subr.bf16.mxu1 %v2464_v41  ;;  %v112_v2 = vld [vmem:[#allocation4 + $0x168] sm:$0xff]  ;;  %v389_v4 = vld [vmem:[#allocation6 + $0x20] sm:$0xff]  ;;  %v2476_v5 = vpack.c.bf16 %v102_v61, %v99_v60  ;;  %v105_v6 = vld [vmem:[#allocation4 + $0x130] sm:$0xff] }
  0x35   :  { %2439 = vmatpush1.bf16.msra.mxu0 %v2438_v31  ;;  %v386_v3 = vld [vmem:[#allocation6 + $0x8] sm:$0xff]  ;;  %v2454_v8 = vpack.c.bf16 %v112_v2, %v109_v1  ;;  %v385_v10 = vld [vmem:[#allocation6] sm:$0xff]  ;;  %v388_v11 = vld [vmem:[#allocation6 + $0x18] sm:$0xff] }
  0x36   :  { %2441 = vmatprep.subr.bf16.mxu0 %v2440_v34  ;;  %v108_v7 = vld [vmem:[#allocation4 + $0x148] sm:$0xff]  ;;  %v3205_v9 = vpack.c.bf16 %v389_v4, %v386_v3  ;;  %v392_v12 = vld [vmem:[#allocation6 + $0x38] sm:$0xff]  ;;  %v395_v13 = vld [vmem:[#allocation6 + $0x50] sm:$0xff]  ;;  %v3207_v17 = vpack.c.bf16 %v388_v11, %v385_v10 }
  0x37   :  { %2467 = vmatpush3.bf16.msra.mxu1 %v2464_v41  ;;  %v2480_v14 = vpack.c.bf16 %v108_v7, %v105_v6  ;;  %v111_v15 = vld [vmem:[#allocation4 + $0x160] sm:$0xff]  ;;  %v114_v16 = vld [vmem:[#allocation4 + $0x178] sm:$0xff]  ;;  %v3210_v18 = vpack.c.bf16 %v395_v13, %v392_v12  ;;  %v391_v19 = vld [vmem:[#allocation6 + $0x30] sm:$0xff] }
  0x38   :  { %2469 = vmatprep.subr.bf16.mxu1 %v2468_v50  ;;  %v394_v20 = vld [vmem:[#allocation6 + $0x48] sm:$0xff]  ;;  %v401_v22 = vld [vmem:[#allocation6 + $0x80] sm:$0xff]  ;;  %v2484_v23 = vpack.c.bf16 %v114_v16, %v111_v15  ;;  %v400_v28 = vld [vmem:[#allocation6 + $0x78] sm:$0xff] }
  0x39   :  { %2443 = vmatpush1.bf16.msra.mxu0 %v2442_v42  ;;  %v398_v21 = vld [vmem:[#allocation6 + $0x68] sm:$0xff]  ;;  %v3218_v25 = vpack.c.bf16 %v394_v20, %v391_v19  ;;  %v397_v27 = vld [vmem:[#allocation6 + $0x60] sm:$0xff]  ;;  %v404_v29 = vld [vmem:[#allocation6 + $0x98] sm:$0xff] }
  0x3a   :  { %2445 = vmatprep.subr.bf16.mxu0 %v2444_v45  ;;  %v60_v24 = vld [vmem:[%s3690_s0 + $0x8] sm:$0xff]  ;;  %v3221_v26 = vpack.c.bf16 %v401_v22, %v398_v21  ;;  %v407_v30 = vld [vmem:[#allocation6 + $0xb0] sm:$0xff]  ;;  %v3228_v34 = vpack.c.bf16 %v400_v28, %v397_v27  ;;  %v413_v39 = vld [vmem:[#allocation6 + $0xe0] sm:$0xff] }
  0x3b   :  { %2471 = vmatpush3.bf16.msra.mxu1 %v2468_v50  ;;  %v387_v31 = vld [vmem:[#allocation6 + $0x10] sm:$0xff]  ;;  %v390_v32 = vld [vmem:[#allocation6 + $0x28] sm:$0xff]  ;;  %v3231_v35 = vpack.c.bf16 %v407_v30, %v404_v29  ;;  %v393_v42 = vld [vmem:[#allocation6 + $0x40] sm:$0xff] }
  0x3c   :  { %2473 = vmatprep.subr.bf16.mxu1 %v2472_v59  ;;  %v61_v33 = vld [vmem:[%s3690_s0 + $0x10] sm:$0xff]  ;;  %v406_v37 = vld [vmem:[#allocation6 + $0xa8] sm:$0xff]  ;;  %v3234_v41 = vpack.c.bf16 %v390_v32, %v387_v31  ;;  %v396_v43 = vld [vmem:[#allocation6 + $0x58] sm:$0xff] }
  0x3d   :  { %2447 = vmatpush1.bf16.msra.mxu0 %v2446_v53  ;;  %v410_v38 = vld [vmem:[#allocation6 + $0xc8] sm:$0xff]  ;;  %v62_v44 = vld [vmem:[%s3690_s0 + $0x18] sm:$0xff]  ;;  %v409_v47 = vld [vmem:[#allocation6 + $0xc0] sm:$0xff]  ;;  %v3247_v51 = vpack.c.bf16 %v396_v43, %v393_v42 }
  0x3e   :  { %2449 = vmatprep.subr.bf16.mxu0 %v2448_v54  ;;  %v3244_v46 = vpack.c.bf16 %v413_v39, %v410_v38  ;;  %v412_v48 = vld [vmem:[#allocation6 + $0xd8] sm:$0xff]  ;;  %v419_v50 = vld [vmem:[#allocation6 + $0x110] sm:$0xff]  ;;  %v402_v53 = vld [vmem:[#allocation6 + $0x88] sm:$0xff] }
  0x3f   :  { %2475 = vmatpush3.bf16.msra.mxu1 %v2472_v59  ;;  %v416_v49 = vld [vmem:[#allocation6 + $0xf8] sm:$0xff]  ;;  %v399_v52 = vld [vmem:[#allocation6 + $0x70] sm:$0xff]  ;;  %v63_v54 = vld [vmem:[%s3690_s0 + $0x20] sm:$0xff]  ;;  %v3255_v55 = vpack.c.bf16 %v412_v48, %v409_v47 }
  0x40   :  { %2477 = vmatprep.subr.bf16.mxu1 %v2476_v5  ;;  %v3258_v56 = vpack.c.bf16 %v419_v50, %v416_v49  ;;  %v415_v57 = vld [vmem:[#allocation6 + $0xf0] sm:$0xff]  ;;  %v418_v58 = vld [vmem:[#allocation6 + $0x108] sm:$0xff]  ;;  %v425_v60 = vld [vmem:[#allocation6 + $0x140] sm:$0xff]  ;;  %v3261_v61 = vpack.c.bf16 %v402_v53, %v399_v52 }
  0x41   :  { %2451 = vmatpush1.bf16.msra.mxu0 %v2450_v62  ;;  %v422_v59 = vld [vmem:[#allocation6 + $0x128] sm:$0xff]  ;;  %v405_v62 = vld [vmem:[#allocation6 + $0xa0] sm:$0xff]  ;;  %v3269_v2 = vpack.c.bf16 %v418_v58, %v415_v57  ;;  %v65_v3 = vld [vmem:[%s3690_s0 + $0x30] sm:$0xff] }
  0x42   :  { %2453 = vmatprep.subr.bf16.mxu0 %v2452_v63  ;;  %v408_v63 = vld [vmem:[#allocation6 + $0xb8] sm:$0xff]  ;;  %v64_v1 = vld [vmem:[%s3690_s0 + $0x28] sm:$0xff]  ;;  %v3275_v4 = vpack.c.bf16 %v425_v60, %v422_v59  ;;  %v411_v11 = vld [vmem:[#allocation6 + $0xd0] sm:$0xff] }
  0x43   :  { %2479 = vmatpush3.bf16.msra.mxu1 %v2476_v5  ;;  %v421_v5 = vld [vmem:[#allocation6 + $0x120] sm:$0xff]  ;;  %v424_v6 = vld [vmem:[#allocation6 + $0x138] sm:$0xff]  ;;  %v3278_v10 = vpack.c.bf16 %v408_v63, %v405_v62  ;;  %v414_v12 = vld [vmem:[#allocation6 + $0xe8] sm:$0xff] }
  0x44   :  { %2481 = vmatprep.subr.bf16.mxu1 %v2480_v14  ;;  %v428_v7 = vld [vmem:[#allocation6 + $0x158] sm:$0xff]  ;;  %v3283_v13 = vpack.c.bf16 %v424_v6, %v421_v5  ;;  %v427_v16 = vld [vmem:[#allocation6 + $0x150] sm:$0xff]  ;;  %v430_v19 = vld [vmem:[#allocation6 + $0x168] sm:$0xff]  ;;  %v3292_v20 = vpack.c.bf16 %v414_v12, %v411_v11 }
  0x45   :  { %2455 = vmatpush1.bf16.msra.mxu0 %v2454_v8  ;;  %v431_v8 = vld [vmem:[#allocation6 + $0x170] sm:$0xff]  ;;  %v417_v21 = vld [vmem:[#allocation6 + $0x100] sm:$0xff]  ;;  %v420_v22 = vld [vmem:[#allocation6 + $0x118] sm:$0xff] }
  0x46   :  { %2489 = vmatprep.subr.bf16.mxu0 %v3205_v9  ;;  %v3289_v15 = vpack.c.bf16 %v431_v8, %v428_v7  ;;  %v423_v27 = vld [vmem:[#allocation6 + $0x130] sm:$0xff]  ;;  %v426_v28 = vld [vmem:[#allocation6 + $0x148] sm:$0xff]  ;;  %v429_v30 = vld [vmem:[#allocation6 + $0x160] sm:$0xff] }
  0x47   :  { %2483 = vmatpush3.bf16.msra.mxu1 %v2480_v14  ;;  %v66_v14 = vld [vmem:[%s3690_s0 + $0x38] sm:$0xff]  ;;  %v3310_v29 = vpack.c.bf16 %v426_v28, %v423_v27  ;;  %v115_v38 = vld [vmem:[%s3693_s3] sm:$0x7] }
  0x48   :  { %197 = vmatmul.mubr.f32.vlgmr.msra.gmra.mrb[0].mxu0 %v3202_v36  ;;  %2485 = vmatprep.subr.bf16.mxu1 %v2484_v23  ;;  %v403_v36 = vld [vmem:[#allocation6 + $0x90] sm:$0xff]  ;;  %v432_v31 = vld [vmem:[#allocation6 + $0x178] sm:$0xff]  ;;  %v3382_v28 = vld [vmem:[%s3694_s4] ss:$0 sm:$0xff] }
  0x49   :  { %2491 = vmatpush1.bf16.msra.mxu0 %v3207_v17  ;;  %202 = vmatprep.mubr.f32.mxu0 %v3131_v0  ;;  %v3241_v45 = vpack.c.bf16 %v406_v37, %v403_v36  ;;  %v3318_v32 = vpack.c.bf16 %v432_v31, %v429_v30 }
  0x4a   :  { %2493 = vmatprep.subr.bf16.mxu0 %v3210_v18 }
  0x4b   :  { %2487 = vmatpush3.bf16.msra.mxu1 %v2484_v23  ;;  %v3299_v23 = vpack.c.bf16 %v430_v19, %v427_v16 }
  0x4c   :  { %203 = vmatmul.mubr.f32.gmra.mrb[2].mxu0 %v60_v24  ;;  %2520 = vmatprep.subr.bf16.mxu1 %v3132_v40 }
  0x4d   :  { %2495 = vmatpush1.bf16.msra.mxu0 %v3218_v25  ;;  %208 = vmatprep.mubr.f32.mxu0 %v3131_v0 }
  0x4e   :  { %2497 = vmatprep.subr.bf16.mxu0 %v3221_v26  ;;  %2098 = vmatmul.mubr.f32.vlgmr.msra.gmra.mrb[0].mxu1 %v60_v24  ;;  %v3303_v24 = vpack.c.bf16 %v420_v22, %v417_v21 }
  0x4f   :  { %2522 = vmatpush3.bf16.msra.mxu1 %v3234_v41  ;;  %2100 = vmatprep.mubr.f32.mxu1 %v61_v33 }
  0x50   :  { %209 = vmatmul.mubr.f32.gmra.mrb[4].mxu0 %v61_v33  ;;  %2523 = vmatprep.subr.bf16.mxu1 %v3132_v40  ;;  %v117_v33 = vlaneseq }
  0x51   :  { %2499 = vmatpush1.bf16.msra.mxu0 %v3228_v34  ;;  %214 = vmatprep.mubr.f32.mxu0 %v3131_v0 }
  0x52   :  { %2501 = vmatprep.subr.bf16.mxu0 %v3231_v35  ;;  %2101 = vmatmul.mubr.f32.gmra.mrb[2].mxu1 %v62_v44  ;;  %v118_v36 = vshrl.u32 %v117_v33, 7 }
  0x53   :  { %2525 = vmatpush3.bf16.msra.mxu1 %v3247_v51  ;;  %2103 = vmatprep.mubr.f32.mxu1 %v63_v54 }
  0x54   :  { %215 = vmatmul.mubr.f32.gmra.mrb[6].mxu0 %v62_v44  ;;  %2526 = vmatprep.subr.bf16.mxu1 %v3132_v40  ;;  %v127_v37 = vsub.s32 2, %v118_v36  ;;  %v119_v63 = vsub.s32 0, %v118_v36 }
  0x55   :  { %2503 = vmatpush1.bf16.msra.mxu0 %v3241_v45  ;;  %220 = vmatprep.mubr.f32.mxu0 %v3131_v0 }
  0x56   :  { %2505 = vmatprep.subr.bf16.mxu0 %v3244_v46  ;;  %2104 = vmatmul.mubr.f32.gmra.mrb[4].mxu1 %v64_v1  ;;  %v128_v39 = vrot.slane %v115_v38, %v127_v37 }
  0x57   :  { %2528 = vmatpush3.bf16.msra.mxu1 %v3261_v61  ;;  %2106 = vmatprep.mubr.f32.mxu1 %v65_v3 }
  0x58   :  { %221 = vmatmul.mubr.f32.gmra.mrb[8].mxu0 %v63_v54  ;;  %2529 = vmatprep.subr.bf16.mxu1 %v3132_v40 }
  0x59   :  { %2507 = vmatpush1.bf16.msra.mxu0 %v3255_v55  ;;  %226 = vmatprep.mubr.f32.mxu0 %v3131_v0 }
  0x5a   :  { %2509 = vmatprep.subr.bf16.mxu0 %v3258_v56  ;;  %2107 = vmatmul.mubr.f32.gmra.mrb[6].mxu1 %v66_v14 }
  0x5b   :  { %2531 = vmatpush3.bf16.msra.mxu1 %v3278_v10  ;;  %2141 = vmatprep.mubr.msk.f32.mxu1 %vm3133_vm0, %v3131_v0 }
  0x5c   :  { %227 = vmatmul.mubr.f32.gmra.mrb[10].mxu0 %v64_v1  ;;  %2532 = vmatprep.subr.bf16.mxu1 %v3132_v40  ;;  %v123_v1 = vsub.s32 1, %v118_v36 }
  0x5d   :  { %2511 = vmatpush1.bf16.msra.mxu0 %v3269_v2  ;;  %232 = vmatprep.mubr.f32.mxu0 %v3131_v0 }
  0x5e   :  { %2513 = vmatprep.subr.bf16.mxu0 %v3275_v4  ;;  %v3375_v6 = vrot.slane %v115_v38, %v123_v1 }
  0x5f   :  { %2534 = vmatpush3.bf16.msra.mxu1 %v3292_v20 }
  0x60   :  { %233 = vmatmul.mubr.f32.gmra.mrb[12].mxu0 %v65_v3  ;;  %2535 = vmatprep.subr.bf16.mxu1 %v3132_v40  ;;  %v3373_v3 = vrot.slane %v115_v38, %v119_v63 }
  0x61   :  { %2515 = vmatpush1.bf16.msra.mxu0 %v3283_v13  ;;  %238 = vmatprep.mubr.f32.mxu0 %v3131_v0 }
  0x62   :  { %2517 = vmatprep.subr.bf16.mxu0 %v3289_v15 }
  0x63   :  { %2537 = vmatpush3.bf16.msra.mxu1 %v3303_v24 }
  0x64   :  { %239 = vmatmul.mubr.f32.gmra.mrb[14].mxu0 %v66_v14  ;;  %2538 = vmatprep.subr.bf16.mxu1 %v3132_v40 }
  0x65   :  { %2519 = vmatpush1.bf16.msra.mxu0 %v3299_v23  ;;  %497 = vmatprep.mubr.f32.mxu0 %v3131_v0 }
  0x66   :  { %2545 = vmatprep.subr.bf16.mxu0 %v3205_v9 }
  0x67   :  { %2540 = vmatpush3.bf16.msra.mxu1 %v3310_v29 }
  0x68   :  { %498 = vmatmul.mubr.f32.vlgmr.msra.gmra.mrb[0].mxu0 %v3131_v0  ;;  %2541 = vmatprep.subr.bf16.mxu1 %v3132_v40 }
  0x69   :  { %2547 = vmatpush1.bf16.msra.mxu0 %v3207_v17  ;;  %664 = vmatprep.mubr.f32.mxu0 %v3131_v0 }
  0x6a   :  { %2549 = vmatprep.subr.bf16.mxu0 %v3210_v18 }
  0x6b   :  { %2543 = vmatpush3.bf16.msra.mxu1 %v3318_v32 }
  0x6c   :  { %2576 = vmatprep.subr.bf16.mxu1 %v3132_v40 }
  0x6d   :  { %2551 = vmatpush1.bf16.msra.mxu0 %v3218_v25 }
  0x6e   :  { %2553 = vmatprep.subr.bf16.mxu0 %v3221_v26  ;;  %2142 = vmatmul.mubr.f32.vlgmr.msra.gmra.mrb[8].mxu1 %v3131_v0 }
  0x6f   :  { %2578 = vmatpush3.bf16.msra.mxu1 %v3234_v41  ;;  %2176 = vmatprep.mubr.msk.f32.mxu1 %vm3133_vm0, %v3131_v0 }
  0x70   :  { %2579 = vmatprep.subr.bf16.mxu1 %v3132_v40 }
  0x71   :  { %2555 = vmatpush1.bf16.msra.mxu0 %v3228_v34 }
  0x72   :  { %2557 = vmatprep.subr.bf16.mxu0 %v3231_v35 }
  0x73   :  { %2581 = vmatpush3.bf16.msra.mxu1 %v3247_v51 }
  0x74   :  { %2582 = vmatprep.subr.bf16.mxu1 %v3132_v40 }
  0x75   :  { %2559 = vmatpush1.bf16.msra.mxu0 %v3241_v45 }
  0x76   :  { %2561 = vmatprep.subr.bf16.mxu0 %v3244_v46 }
  0x77   :  { %2584 = vmatpush3.bf16.msra.mxu1 %v3261_v61 }
  0x78   :  { %2585 = vmatprep.subr.bf16.mxu1 %v3132_v40 }
  0x79   :  { %2563 = vmatpush1.bf16.msra.mxu0 %v3255_v55 }
  0x7a   :  { %2565 = vmatprep.subr.bf16.mxu0 %v3258_v56 }
  0x7b   :  { %2587 = vmatpush3.bf16.msra.mxu1 %v3278_v10 }
  0x7c   :  { %2588 = vmatprep.subr.bf16.mxu1 %v3132_v40 }
  0x7d   :  { %2567 = vmatpush1.bf16.msra.mxu0 %v3269_v2 }
  0x7e   :  { %2569 = vmatprep.subr.bf16.mxu0 %v3275_v4 }
  0x7f   :  { %2590 = vmatpush3.bf16.msra.mxu1 %v3292_v20 }
  0x80   :  { %2591 = vmatprep.subr.bf16.mxu1 %v3132_v40 }
  0x81   :  { %2571 = vmatpush1.bf16.msra.mxu0 %v3283_v13 }
  0x82   :  { %2573 = vmatprep.subr.bf16.mxu0 %v3289_v15 }
  0x83   :  { %2593 = vmatpush3.bf16.msra.mxu1 %v3303_v24 }
  0x84   :  { %2594 = vmatprep.subr.bf16.mxu1 %v3132_v40 }
  0x85   :  { %2575 = vmatpush1.bf16.msra.mxu0 %v3299_v23 }
  0x86   :  { %2601 = vmatprep.subr.bf16.mxu0 %v3205_v9 }
  0x87   :  { %2596 = vmatpush3.bf16.msra.mxu1 %v3310_v29 }
  0x88   :  { %2597 = vmatprep.subr.bf16.mxu1 %v3132_v40 }
  0x8b   :  { %2599 = vmatpush3.bf16.msra.mxu1 %v3318_v32 }
  0x8c   :  { %2632 = vmatprep.subr.bf16.mxu1 %v3132_v40 }
 0x121   :  { %v2099_v42 = vpop.f32.mrb[0].mxu1 }
 0x122   :  { %v3359_v43 = vadd.f32 %v2099_v42, %v128_v39  ;;  %v311_v44 = vpop.f32.mrb[1].mxu1 }
 0x123   :  { %v312_v36 = vadd.f32 %v311_v44, %v128_v39 }
 0x125   :  { %v2102_v47 = vpop.f32.mrb[2].mxu1 }
 0x126   :  { %v3361_v48 = vadd.f32 %v2102_v47, %v128_v39  ;;  %v321_v49 = vpop.f32.mrb[3].mxu1 }
 0x127   :  { %v3363_v50 = vadd.f32 %v321_v49, %v128_v39 }
 0x129   :  { %v2105_v52 = vpop.f32.mrb[4].mxu1 }
 0x12a   :  { %v3365_v53 = vadd.f32 %v2105_v52, %v128_v39  ;;  %v331_v54 = vpop.f32.mrb[5].mxu1 }
 0x12b   :  { %v3367_v57 = vadd.f32 %v331_v54, %v128_v39 }
 0x12d   :  { %v2108_v58 = vpop.f32.mrb[6].mxu1 }
 0x12e   :  { %v3369_v59 = vadd.f32 %v2108_v58, %v128_v39  ;;  %v341_v60 = vpop.f32.mrb[7].mxu1 }
 0x12f   :  { %v3371_v62 = vadd.f32 %v341_v60, %v128_v39 }
 0x13b   :  { %v499_v5 = vpop.f32.mrb[0].mxu0 }
 0x13c   :  { %v2960_v7 = vadd.f32 %v499_v5, %v3373_v3  ;;  %v501_v8 = vpop.f32.mrb[1].mxu0 }
 0x13d   :  { %v2961_v12 = vadd.f32 %v501_v8, %v3375_v6 }
 0x13e   :  { %v1871_v11 = vmul.f32 -1.442695, %v2960_v7 }
 0x13f   :  { %v1872_v14 = vmul.f32 -1.442695, %v2961_v12 }
 0x140   :  { %2999 = vpow2.f32 %v1871_v11 }
 0x141   :  { %v570_v16 = vpop.f32.mrb[8].mxu1  ;;  %3001 = vpow2.f32 %v1872_v14 }
 0x142   :  { %v2143_v19 = vpop.f32.mrb[9].mxu1  ;;  %v588_v31 = vadd.f32 %v3382_v28, %v570_v16 }
 0x14a   :  { %v3000_v21 = vpop.eup %2999 }
 0x14b   :  { %v578_v22 = vadd.f32 1.0, %v3000_v21  ;;  %v3002_v27 = vpop.eup %3001 }
 0x14c   :  { %v585_v30 = vadd.f32 1.0, %v3002_v27 }
 0x14d   :  { %3003 = vrcp.f32 %v578_v22 }
 0x14e   :  { %3005 = vrcp.f32 %v585_v30 }
 0x157   :  { %v3004_v33 = vpop.eup %3003 }
 0x158   :  { %v589_v37 = vmul.f32 %v3004_v33, %v588_v31  ;;  %v3006_v42 = vpop.eup %3005 }
 0x159   :  { %v592_v47 = vsub.f32 1.0, %v3006_v42  ;;  %v594_v54 = vmul.f32 0.0, %v3006_v42 }
 0x15a   :  { %v590_v38 = vadd.f32 %v589_v37, %v312_v36 }
 0x15c   :  { %3007 = vtanh.f32 %v590_v38 }
 0x166   :  { %v3008_v49 = vpop.eup %3007 }
 0x167   :  { %v593_v52 = vmul.f32 %v3008_v49, %v592_v47 }
 0x169   :  { %v595_v58 = vadd.f32 %v594_v54, %v593_v52 }
 0x16b   :  { %665 = vmatmul.mubr.f32.vlgmr.msra.gmra.mrb[2].mxu0 %v595_v58  ;;  %2177 = vmatmul.mubr.f32.vlgmr.msra.gmra.mrb[10].mxu1 %v595_v58 }
 0x16c   :  { %2603 = vmatpush1.bf16.msra.mxu0 %v3207_v17  ;;  %2634 = vmatpush3.bf16.msra.mxu1 %v3234_v41 }
 0x16d   :  { %2605 = vmatprep.subr.bf16.mxu0 %v3210_v18  ;;  %2635 = vmatprep.subr.bf16.mxu1 %v3132_v40 }
 0x16e   :  { %831 = vmatprep.mubr.f32.mxu0 %v3131_v0  ;;  %2211 = vmatprep.mubr.msk.f32.mxu1 %vm3133_vm0, %v3131_v0 }
 0x170   :  { %2607 = vmatpush1.bf16.msra.mxu0 %v3218_v25  ;;  %2637 = vmatpush3.bf16.msra.mxu1 %v3247_v51 }
 0x171   :  { %2609 = vmatprep.subr.bf16.mxu0 %v3221_v26  ;;  %2638 = vmatprep.subr.bf16.mxu1 %v3132_v40 }
 0x174   :  { %2611 = vmatpush1.bf16.msra.mxu0 %v3228_v34  ;;  %2640 = vmatpush3.bf16.msra.mxu1 %v3261_v61 }
 0x175   :  { %2613 = vmatprep.subr.bf16.mxu0 %v3231_v35  ;;  %2641 = vmatprep.subr.bf16.mxu1 %v3132_v40 }
 0x178   :  { %2615 = vmatpush1.bf16.msra.mxu0 %v3241_v45  ;;  %2643 = vmatpush3.bf16.msra.mxu1 %v3278_v10 }
 0x179   :  { %2617 = vmatprep.subr.bf16.mxu0 %v3244_v46  ;;  %2644 = vmatprep.subr.bf16.mxu1 %v3132_v40 }
 0x17c   :  { %2619 = vmatpush1.bf16.msra.mxu0 %v3255_v55  ;;  %2646 = vmatpush3.bf16.msra.mxu1 %v3292_v20 }
 0x17d   :  { %2621 = vmatprep.subr.bf16.mxu0 %v3258_v56  ;;  %2647 = vmatprep.subr.bf16.mxu1 %v3132_v40 }
 0x180   :  { %2623 = vmatpush1.bf16.msra.mxu0 %v3269_v2  ;;  %2649 = vmatpush3.bf16.msra.mxu1 %v3303_v24 }
 0x181   :  { %2625 = vmatprep.subr.bf16.mxu0 %v3275_v4  ;;  %2650 = vmatprep.subr.bf16.mxu1 %v3132_v40 }
 0x184   :  { %2627 = vmatpush1.bf16.msra.mxu0 %v3283_v13  ;;  %2652 = vmatpush3.bf16.msra.mxu1 %v3310_v29 }
 0x185   :  { %2629 = vmatprep.subr.bf16.mxu0 %v3289_v15  ;;  %2653 = vmatprep.subr.bf16.mxu1 %v3132_v40 }
 0x188   :  { %2631 = vmatpush1.bf16.msra.mxu0 %v3299_v23  ;;  %2655 = vmatpush3.bf16.msra.mxu1 %v3318_v32 }
 0x189   :  { %2657 = vmatprep.subr.bf16.mxu0 %v3205_v9  ;;  %2688 = vmatprep.subr.bf16.mxu1 %v3132_v40 }
 0x23e   :  { %v666_v39 = vpop.f32.mrb[2].mxu0  ;;  %v737_v44 = vpop.f32.mrb[10].mxu1 }
 0x23f   :  { %v2962_v60 = vadd.f32 %v666_v39, %v3373_v3  ;;  %v668_v63 = vpop.f32.mrb[3].mxu0  ;;  %v2178_v1 = vpop.f32.mrb[11].mxu1  ;;  %v755_v19 = vadd.f32 %v3382_v28, %v737_v44 }
 0x240   :  { %v2963_v7 = vadd.f32 %v668_v63, %v3375_v6 }
 0x241   :  { %v1873_v5 = vmul.f32 -1.442695, %v2962_v60 }
 0x242   :  { %v1874_v8 = vmul.f32 -1.442695, %v2963_v7 }
 0x243   :  { %3009 = vpow2.f32 %v1873_v5 }
 0x244   :  { %3011 = vpow2.f32 %v1874_v8 }
 0x24d   :  { %v3010_v11 = vpop.eup %3009 }
 0x24e   :  { %v745_v12 = vadd.f32 1.0, %v3010_v11  ;;  %v3012_v14 = vpop.eup %3011 }
 0x24f   :  { %v752_v16 = vadd.f32 1.0, %v3012_v14 }
 0x250   :  { %3013 = vrcp.f32 %v745_v12 }
 0x251   :  { %3015 = vrcp.f32 %v752_v16 }
 0x25a   :  { %v3014_v21 = vpop.eup %3013 }
 0x25b   :  { %v756_v22 = vmul.f32 %v3014_v21, %v755_v19  ;;  %v3016_v30 = vpop.eup %3015 }
 0x25c   :  { %v759_v31 = vsub.f32 1.0, %v3016_v30  ;;  %v761_v37 = vmul.f32 %v3016_v30, %v595_v58 }
 0x25d   :  { %v757_v27 = vadd.f32 %v756_v22, %v3359_v43 }
 0x25f   :  { %3017 = vtanh.f32 %v757_v27 }
 0x269   :  { %v3018_v33 = vpop.eup %3017 }
 0x26a   :  { %v760_v36 = vmul.f32 %v3018_v33, %v759_v31 }
 0x26c   :  { %v762_v38 = vadd.f32 %v761_v37, %v760_v36 }
 0x26e   :  { %832 = vmatmul.mubr.f32.vlgmr.msra.gmra.mrb[4].mxu0 %v762_v38  ;;  %2212 = vmatmul.mubr.f32.vlgmr.msra.gmra.mrb[12].mxu1 %v762_v38 }
 0x26f   :  { %2659 = vmatpush1.bf16.msra.mxu0 %v3207_v17  ;;  %2690 = vmatpush3.bf16.msra.mxu1 %v3234_v41 }
 0x270   :  { %2661 = vmatprep.subr.bf16.mxu0 %v3210_v18  ;;  %2691 = vmatprep.subr.bf16.mxu1 %v3132_v40 }
 0x271   :  { %998 = vmatprep.mubr.f32.mxu0 %v3131_v0  ;;  %2246 = vmatprep.mubr.msk.f32.mxu1 %vm3133_vm0, %v3131_v0 }
 0x273   :  { %2663 = vmatpush1.bf16.msra.mxu0 %v3218_v25  ;;  %2693 = vmatpush3.bf16.msra.mxu1 %v3247_v51 }
 0x274   :  { %2665 = vmatprep.subr.bf16.mxu0 %v3221_v26  ;;  %2694 = vmatprep.subr.bf16.mxu1 %v3132_v40 }
 0x277   :  { %2667 = vmatpush1.bf16.msra.mxu0 %v3228_v34  ;;  %2696 = vmatpush3.bf16.msra.mxu1 %v3261_v61 }
 0x278   :  { %2669 = vmatprep.subr.bf16.mxu0 %v3231_v35  ;;  %2697 = vmatprep.subr.bf16.mxu1 %v3132_v40 }
 0x27b   :  { %2671 = vmatpush1.bf16.msra.mxu0 %v3241_v45  ;;  %2699 = vmatpush3.bf16.msra.mxu1 %v3278_v10 }
 0x27c   :  { %2673 = vmatprep.subr.bf16.mxu0 %v3244_v46  ;;  %2700 = vmatprep.subr.bf16.mxu1 %v3132_v40 }
 0x27f   :  { %2675 = vmatpush1.bf16.msra.mxu0 %v3255_v55  ;;  %2702 = vmatpush3.bf16.msra.mxu1 %v3292_v20 }
 0x280   :  { %2677 = vmatprep.subr.bf16.mxu0 %v3258_v56  ;;  %2703 = vmatprep.subr.bf16.mxu1 %v3132_v40 }
 0x283   :  { %2679 = vmatpush1.bf16.msra.mxu0 %v3269_v2  ;;  %2705 = vmatpush3.bf16.msra.mxu1 %v3303_v24 }
 0x284   :  { %2681 = vmatprep.subr.bf16.mxu0 %v3275_v4  ;;  %2706 = vmatprep.subr.bf16.mxu1 %v3132_v40 }
 0x287   :  { %2683 = vmatpush1.bf16.msra.mxu0 %v3283_v13  ;;  %2708 = vmatpush3.bf16.msra.mxu1 %v3310_v29 }
 0x288   :  { %2685 = vmatprep.subr.bf16.mxu0 %v3289_v15  ;;  %2709 = vmatprep.subr.bf16.mxu1 %v3132_v40 }
 0x28b   :  { %2687 = vmatpush1.bf16.msra.mxu0 %v3299_v23  ;;  %2711 = vmatpush3.bf16.msra.mxu1 %v3318_v32 }
 0x28c   :  { %2713 = vmatprep.subr.bf16.mxu0 %v3205_v9  ;;  %2744 = vmatprep.subr.bf16.mxu1 %v3132_v40 }
 0x341   :  { %v833_v43 = vpop.f32.mrb[4].mxu0  ;;  %v904_v42 = vpop.f32.mrb[12].mxu1 }
 0x342   :  { %v2964_v47 = vadd.f32 %v833_v43, %v3373_v3  ;;  %v835_v49 = vpop.f32.mrb[5].mxu0  ;;  %v2213_v52 = vpop.f32.mrb[13].mxu1  ;;  %v922_v5 = vadd.f32 %v3382_v28, %v904_v42 }
 0x343   :  { %v2965_v58 = vadd.f32 %v835_v49, %v3375_v6 }
 0x344   :  { %v1875_v54 = vmul.f32 -1.442695, %v2964_v47 }
 0x345   :  { %v1876_v39 = vmul.f32 -1.442695, %v2965_v58 }
 0x346   :  { %3019 = vpow2.f32 %v1875_v54 }
 0x347   :  { %3021 = vpow2.f32 %v1876_v39 }
 0x350   :  { %v3020_v44 = vpop.eup %3019 }
 0x351   :  { %v912_v60 = vadd.f32 1.0, %v3020_v44  ;;  %v3022_v63 = vpop.eup %3021 }
 0x352   :  { %v919_v1 = vadd.f32 1.0, %v3022_v63 }
 0x353   :  { %3023 = vrcp.f32 %v912_v60 }
 0x354   :  { %3025 = vrcp.f32 %v919_v1 }
 0x35d   :  { %v3024_v7 = vpop.eup %3023 }
 0x35e   :  { %v923_v8 = vmul.f32 %v3024_v7, %v922_v5  ;;  %v3026_v12 = vpop.eup %3025 }
 0x35f   :  { %v926_v14 = vsub.f32 1.0, %v3026_v12  ;;  %v928_v21 = vmul.f32 %v3026_v12, %v762_v38 }
 0x360   :  { %v924_v11 = vadd.f32 %v923_v8, %v3363_v50 }
 0x362   :  { %3027 = vtanh.f32 %v924_v11 }
 0x36c   :  { %v3028_v16 = vpop.eup %3027 }
 0x36d   :  { %v927_v19 = vmul.f32 %v3028_v16, %v926_v14 }
 0x36f   :  { %v929_v22 = vadd.f32 %v928_v21, %v927_v19 }
 0x371   :  { %999 = vmatmul.mubr.f32.vlgmr.msra.gmra.mrb[6].mxu0 %v929_v22  ;;  %2247 = vmatmul.mubr.f32.vlgmr.msra.gmra.mrb[14].mxu1 %v929_v22 }
 0x372   :  { %2715 = vmatpush1.bf16.msra.mxu0 %v3207_v17  ;;  %2746 = vmatpush3.bf16.msra.mxu1 %v3234_v41 }
 0x373   :  { %2717 = vmatprep.subr.bf16.mxu0 %v3210_v18  ;;  %2747 = vmatprep.subr.bf16.mxu1 %v3132_v40 }
 0x374   :  { %1165 = vmatprep.mubr.f32.mxu0 %v3131_v0  ;;  %2281 = vmatprep.mubr.msk.f32.mxu1 %vm3133_vm0, %v3131_v0 }
 0x376   :  { %2719 = vmatpush1.bf16.msra.mxu0 %v3218_v25  ;;  %2749 = vmatpush3.bf16.msra.mxu1 %v3247_v51 }
 0x377   :  { %2721 = vmatprep.subr.bf16.mxu0 %v3221_v26  ;;  %2750 = vmatprep.subr.bf16.mxu1 %v3132_v40 }
 0x37a   :  { %2723 = vmatpush1.bf16.msra.mxu0 %v3228_v34  ;;  %2752 = vmatpush3.bf16.msra.mxu1 %v3261_v61 }
 0x37b   :  { %2725 = vmatprep.subr.bf16.mxu0 %v3231_v35  ;;  %2753 = vmatprep.subr.bf16.mxu1 %v3132_v40 }
 0x37e   :  { %2727 = vmatpush1.bf16.msra.mxu0 %v3241_v45  ;;  %2755 = vmatpush3.bf16.msra.mxu1 %v3278_v10 }
 0x37f   :  { %2729 = vmatprep.subr.bf16.mxu0 %v3244_v46  ;;  %2756 = vmatprep.subr.bf16.mxu1 %v3132_v40 }
 0x382   :  { %2731 = vmatpush1.bf16.msra.mxu0 %v3255_v55  ;;  %2758 = vmatpush3.bf16.msra.mxu1 %v3292_v20 }
 0x383   :  { %2733 = vmatprep.subr.bf16.mxu0 %v3258_v56  ;;  %2759 = vmatprep.subr.bf16.mxu1 %v3132_v40 }
 0x386   :  { %2735 = vmatpush1.bf16.msra.mxu0 %v3269_v2  ;;  %2761 = vmatpush3.bf16.msra.mxu1 %v3303_v24 }
 0x387   :  { %2737 = vmatprep.subr.bf16.mxu0 %v3275_v4  ;;  %2762 = vmatprep.subr.bf16.mxu1 %v3132_v40 }
 0x38a   :  { %2739 = vmatpush1.bf16.msra.mxu0 %v3283_v13  ;;  %2764 = vmatpush3.bf16.msra.mxu1 %v3310_v29 }
 0x38b   :  { %2741 = vmatprep.subr.bf16.mxu0 %v3289_v15  ;;  %2765 = vmatprep.subr.bf16.mxu1 %v3132_v40 }
 0x38e   :  { %2743 = vmatpush1.bf16.msra.mxu0 %v3299_v23  ;;  %2767 = vmatpush3.bf16.msra.mxu1 %v3318_v32 }
 0x38f   :  { %2769 = vmatprep.subr.bf16.mxu0 %v3205_v9  ;;  %2800 = vmatprep.subr.bf16.mxu1 %v3132_v40 }
 0x444   :  { %v1000_v50 = vpop.f32.mrb[6].mxu0  ;;  %v1071_v27 = vpop.f32.mrb[14].mxu1 }
 0x445   :  { %v2966_v30 = vadd.f32 %v1000_v50, %v3373_v3  ;;  %v1002_v31 = vpop.f32.mrb[7].mxu0  ;;  %v2248_v33 = vpop.f32.mrb[15].mxu1  ;;  %v1089_v52 = vadd.f32 %v3382_v28, %v1071_v27 }
 0x446   :  { %v2967_v37 = vadd.f32 %v1002_v31, %v3375_v6 }
 0x447   :  { %v1877_v36 = vmul.f32 -1.442695, %v2966_v30 }
 0x448   :  { %v1878_v38 = vmul.f32 -1.442695, %v2967_v37 }
 0x449   :  { %3029 = vpow2.f32 %v1877_v36 }
 0x44a   :  { %3031 = vpow2.f32 %v1878_v38 }
 0x453   :  { %v3030_v43 = vpop.eup %3029 }
 0x454   :  { %v1079_v42 = vadd.f32 1.0, %v3030_v43  ;;  %v3032_v47 = vpop.eup %3031 }
 0x455   :  { %v1086_v49 = vadd.f32 1.0, %v3032_v47 }
 0x456   :  { %3033 = vrcp.f32 %v1079_v42 }
 0x457   :  { %3035 = vrcp.f32 %v1086_v49 }
 0x460   :  { %v3034_v54 = vpop.eup %3033 }
 0x461   :  { %v1090_v58 = vmul.f32 %v3034_v54, %v1089_v52  ;;  %v3036_v44 = vpop.eup %3035 }
 0x462   :  { %v1093_v60 = vsub.f32 1.0, %v3036_v44  ;;  %v1095_v5 = vmul.f32 %v3036_v44, %v929_v22 }
 0x463   :  { %v1091_v39 = vadd.f32 %v1090_v58, %v3361_v48 }
 0x465   :  { %3037 = vtanh.f32 %v1091_v39 }
 0x46f   :  { %v3038_v63 = vpop.eup %3037 }
 0x470   :  { %v1094_v1 = vmul.f32 %v3038_v63, %v1093_v60 }
 0x472   :  { %v1096_v7 = vadd.f32 %v1095_v5, %v1094_v1 }
 0x474   :  { %1166 = vmatmul.mubr.f32.vlgmr.msra.gmra.mrb[8].mxu0 %v1096_v7  ;;  %2282 = vmatmul.mubr.f32.vlgmr.msra.gmra.mrb[16].mxu1 %v1096_v7 }
 0x475   :  { %2771 = vmatpush1.bf16.msra.mxu0 %v3207_v17  ;;  %2802 = vmatpush3.bf16.msra.mxu1 %v3234_v41 }
 0x476   :  { %2773 = vmatprep.subr.bf16.mxu0 %v3210_v18  ;;  %2803 = vmatprep.subr.bf16.mxu1 %v3132_v40 }
 0x477   :  { %1332 = vmatprep.mubr.f32.mxu0 %v3131_v0  ;;  %2316 = vmatprep.mubr.msk.f32.mxu1 %vm3133_vm0, %v3131_v0 }
 0x479   :  { %2775 = vmatpush1.bf16.msra.mxu0 %v3218_v25  ;;  %2805 = vmatpush3.bf16.msra.mxu1 %v3247_v51 }
 0x47a   :  { %2777 = vmatprep.subr.bf16.mxu0 %v3221_v26  ;;  %2806 = vmatprep.subr.bf16.mxu1 %v3132_v40 }
 0x47d   :  { %2779 = vmatpush1.bf16.msra.mxu0 %v3228_v34  ;;  %2808 = vmatpush3.bf16.msra.mxu1 %v3261_v61 }
 0x47e   :  { %2781 = vmatprep.subr.bf16.mxu0 %v3231_v35  ;;  %2809 = vmatprep.subr.bf16.mxu1 %v3132_v40 }
 0x481   :  { %2783 = vmatpush1.bf16.msra.mxu0 %v3241_v45  ;;  %2811 = vmatpush3.bf16.msra.mxu1 %v3278_v10 }
 0x482   :  { %2785 = vmatprep.subr.bf16.mxu0 %v3244_v46  ;;  %2812 = vmatprep.subr.bf16.mxu1 %v3132_v40 }
 0x485   :  { %2787 = vmatpush1.bf16.msra.mxu0 %v3255_v55  ;;  %2814 = vmatpush3.bf16.msra.mxu1 %v3292_v20 }
 0x486   :  { %2789 = vmatprep.subr.bf16.mxu0 %v3258_v56  ;;  %2815 = vmatprep.subr.bf16.mxu1 %v3132_v40 }
 0x489   :  { %2791 = vmatpush1.bf16.msra.mxu0 %v3269_v2  ;;  %2817 = vmatpush3.bf16.msra.mxu1 %v3303_v24 }
 0x48a   :  { %2793 = vmatprep.subr.bf16.mxu0 %v3275_v4  ;;  %2818 = vmatprep.subr.bf16.mxu1 %v3132_v40 }
 0x48d   :  { %2795 = vmatpush1.bf16.msra.mxu0 %v3283_v13  ;;  %2820 = vmatpush3.bf16.msra.mxu1 %v3310_v29 }
 0x48e   :  { %2797 = vmatprep.subr.bf16.mxu0 %v3289_v15  ;;  %2821 = vmatprep.subr.bf16.mxu1 %v3132_v40 }
 0x491   :  { %2799 = vmatpush1.bf16.msra.mxu0 %v3299_v23  ;;  %2823 = vmatpush3.bf16.msra.mxu1 %v3318_v32 }
 0x492   :  { %2825 = vmatprep.subr.bf16.mxu0 %v3205_v9  ;;  %2856 = vmatprep.subr.bf16.mxu1 %v3132_v40 }
 0x547   :  { %v1167_v48 = vpop.f32.mrb[8].mxu0  ;;  %v1238_v8 = vpop.f32.mrb[16].mxu1 }
 0x548   :  { %v2968_v11 = vadd.f32 %v1167_v48, %v3373_v3  ;;  %v1169_v12 = vpop.f32.mrb[9].mxu0  ;;  %v2283_v14 = vpop.f32.mrb[17].mxu1  ;;  %v1256_v31 = vadd.f32 %v3382_v28, %v1238_v8 }
 0x549   :  { %v2969_v19 = vadd.f32 %v1169_v12, %v3375_v6 }
 0x54a   :  { %v1879_v16 = vmul.f32 -1.442695, %v2968_v11 }
 0x54b   :  { %v1880_v21 = vmul.f32 -1.442695, %v2969_v19 }
 0x54c   :  { %3039 = vpow2.f32 %v1879_v16 }
 0x54d   :  { %3041 = vpow2.f32 %v1880_v21 }
 0x556   :  { %v3040_v22 = vpop.eup %3039 }
 0x557   :  { %v1246_v50 = vadd.f32 1.0, %v3040_v22  ;;  %v3042_v27 = vpop.eup %3041 }
 0x558   :  { %v1253_v30 = vadd.f32 1.0, %v3042_v27 }
 0x559   :  { %3043 = vrcp.f32 %v1246_v50 }
 0x55a   :  { %3045 = vrcp.f32 %v1253_v30  ;;  %v1772_v30 = vld [vmem:[%s3695_s5 + $0x10] sm:$0xff] }
 0x563   :  { %v3044_v33 = vpop.eup %3043 }
 0x564   :  { %v1257_v36 = vmul.f32 %v3044_v33, %v1256_v31  ;;  %v3046_v38 = vpop.eup %3045  ;;  %v1774_v33 = vld [vmem:[%s3695_s5 + $0x20] sm:$0xff] }
 0x565   :  { %v1260_v43 = vsub.f32 1.0, %v3046_v38  ;;  %v1262_v49 = vmul.f32 %v3046_v38, %v1096_v7  ;;  %v1776_v38 = vld [vmem:[%s3695_s5 + $0x30] sm:$0xff] }
 0x566   :  { %v1258_v37 = vadd.f32 %v1257_v36, %v3367_v57  ;;  %v1775_v36 = vld [vmem:[%s3695_s5 + $0x28] sm:$0xff] }
 0x568   :  { %3047 = vtanh.f32 %v1258_v37  ;;  %v2943_v37 = vpack.c.bf16 %v1775_v36, %v1774_v33 }
 0x572   :  { %v3048_v42 = vpop.eup %3047 }
 0x573   :  { %v1261_v47 = vmul.f32 %v3048_v42, %v1260_v43  ;;  %v1777_v43 = vld [vmem:[%s3695_s5 + $0x38] sm:$0xff] }
 0x574   :  { %v2946_v42 = vpack.c.bf16 %v1777_v43, %v1776_v38 }
 0x575   :  { %v1263_v52 = vadd.f32 %v1262_v49, %v1261_v47  ;;  %v1778_v47 = vld [vmem:[%s3695_s5 + $0x40] sm:$0xff]  ;;  %v1779_v49 = vld [vmem:[%s3695_s5 + $0x48] sm:$0xff] }
 0x577   :  { %1333 = vmatmul.mubr.f32.vlgmr.msra.gmra.mrb[10].mxu0 %v1263_v52  ;;  %2317 = vmatmul.mubr.f32.vlgmr.msra.gmra.mrb[18].mxu1 %v1263_v52 }
 0x578   :  { %2827 = vmatpush1.bf16.msra.mxu0 %v3207_v17  ;;  %2858 = vmatpush3.bf16.msra.mxu1 %v3234_v41 }
 0x579   :  { %2829 = vmatprep.subr.bf16.mxu0 %v3210_v18  ;;  %2859 = vmatprep.subr.bf16.mxu1 %v3132_v40 }
 0x57a   :  { %1499 = vmatprep.mubr.f32.mxu0 %v3131_v0  ;;  %2351 = vmatprep.mubr.msk.f32.mxu1 %vm3133_vm0, %v3131_v0 }
 0x57c   :  { %2831 = vmatpush1.bf16.msra.mxu0 %v3218_v25  ;;  %2861 = vmatpush3.bf16.msra.mxu1 %v3247_v51 }
 0x57d   :  { %2833 = vmatprep.subr.bf16.mxu0 %v3221_v26  ;;  %2862 = vmatprep.subr.bf16.mxu1 %v3132_v40 }
 0x580   :  { %2835 = vmatpush1.bf16.msra.mxu0 %v3228_v34  ;;  %2864 = vmatpush3.bf16.msra.mxu1 %v3261_v61 }
 0x581   :  { %2837 = vmatprep.subr.bf16.mxu0 %v3231_v35  ;;  %2865 = vmatprep.subr.bf16.mxu1 %v3132_v40 }
 0x584   :  { %2839 = vmatpush1.bf16.msra.mxu0 %v3241_v45  ;;  %2867 = vmatpush3.bf16.msra.mxu1 %v3278_v10 }
 0x585   :  { %2841 = vmatprep.subr.bf16.mxu0 %v3244_v46  ;;  %2868 = vmatprep.subr.bf16.mxu1 %v3132_v40 }
 0x588   :  { %2843 = vmatpush1.bf16.msra.mxu0 %v3255_v55  ;;  %2870 = vmatpush3.bf16.msra.mxu1 %v3292_v20 }
 0x589   :  { %2845 = vmatprep.subr.bf16.mxu0 %v3258_v56  ;;  %2871 = vmatprep.subr.bf16.mxu1 %v3132_v40 }
 0x58c   :  { %2847 = vmatpush1.bf16.msra.mxu0 %v3269_v2  ;;  %2873 = vmatpush3.bf16.msra.mxu1 %v3303_v24 }
 0x58d   :  { %2849 = vmatprep.subr.bf16.mxu0 %v3275_v4  ;;  %2874 = vmatprep.subr.bf16.mxu1 %v3132_v40 }
 0x590   :  { %2851 = vmatpush1.bf16.msra.mxu0 %v3283_v13  ;;  %2876 = vmatpush3.bf16.msra.mxu1 %v3310_v29 }
 0x591   :  { %2853 = vmatprep.subr.bf16.mxu0 %v3289_v15  ;;  %2877 = vmatprep.subr.bf16.mxu1 %v3132_v40 }
 0x594   :  { %2855 = vmatpush1.bf16.msra.mxu0 %v3299_v23  ;;  %2879 = vmatpush3.bf16.msra.mxu1 %v3318_v32 }
 0x595   :  { %2881 = vmatprep.subr.bf16.mxu0 %v3205_v9  ;;  %2912 = vmatprep.subr.bf16.mxu1 %v3132_v40 }
 0x64a   :  { %v1334_v57 = vpop.f32.mrb[10].mxu0  ;;  %v1405_v54 = vpop.f32.mrb[18].mxu1 }
 0x64b   :  { %v2970_v58 = vadd.f32 %v1334_v57, %v3373_v3  ;;  %v1336_v39 = vpop.f32.mrb[11].mxu0  ;;  %v2318_v44 = vpop.f32.mrb[19].mxu1  ;;  %v1423_v9 = vadd.f32 %v3382_v28, %v1405_v54  ;;  %v1780_v57 = vld [vmem:[%s3695_s5 + $0x50] sm:$0xff]  ;;  %v1781_v54 = vld [vmem:[%s3695_s5 + $0x58] sm:$0xff] }
 0x64c   :  { %v2971_v63 = vadd.f32 %v1336_v39, %v3375_v6  ;;  %v1782_v39 = vld [vmem:[%s3695_s5 + $0x60] sm:$0xff]  ;;  %v1783_v44 = vld [vmem:[%s3695_s5 + $0x68] sm:$0xff] }
 0x64d   :  { %v1881_v60 = vmul.f32 -1.442695, %v2970_v58  ;;  %v2952_v58 = vpack.c.bf16 %v1781_v54, %v1780_v57 }
 0x64e   :  { %v1882_v1 = vmul.f32 -1.442695, %v2971_v63  ;;  %v1784_v63 = vld [vmem:[%s3695_s5 + $0x70] sm:$0xff] }
 0x64f   :  { %3049 = vpow2.f32 %v1881_v60  ;;  %v2955_v60 = vpack.c.bf16 %v1783_v44, %v1782_v39 }
 0x650   :  { %3051 = vpow2.f32 %v1882_v1  ;;  %v1785_v1 = vld [vmem:[%s3695_s5 + $0x78] sm:$0xff] }
 0x659   :  { %v3050_v5 = vpop.eup %3049 }
 0x65a   :  { %v1413_v7 = vadd.f32 1.0, %v3050_v5  ;;  %v3052_v48 = vpop.eup %3051  ;;  %v2958_v5 = vpack.c.bf16 %v1785_v1, %v1784_v63 }
 0x65b   :  { %v1420_v8 = vadd.f32 1.0, %v3052_v48 }
 0x65c   :  { %3053 = vrcp.f32 %v1413_v7 }
 0x65d   :  { %3055 = vrcp.f32 %v1420_v8 }
 0x666   :  { %v3054_v11 = vpop.eup %3053 }
 0x667   :  { %v1424_v12 = vmul.f32 %v3054_v11, %v1423_v9  ;;  %v3056_v16 = vpop.eup %3055 }
 0x668   :  { %v1427_v19 = vsub.f32 1.0, %v3056_v16  ;;  %v1429_v50 = vmul.f32 %v3056_v16, %v1263_v52  ;;  %v2949_v52 = vpack.c.bf16 %v1779_v49, %v1778_v47 }
 0x669   :  { %v1425_v14 = vadd.f32 %v1424_v12, %v3365_v53  ;;  %v1771_v53 = vld [vmem:[%s3695_s5 + $0x8] sm:$0xff] }
 0x66b   :  { %3057 = vtanh.f32 %v1425_v14 }
 0x675   :  { %v3058_v21 = vpop.eup %3057 }
 0x676   :  { %v1428_v22 = vmul.f32 %v3058_v21, %v1427_v19 }
 0x678   :  { %v1430_v27 = vadd.f32 %v1429_v50, %v1428_v22 }
 0x67a   :  { %1500 = vmatmul.mubr.f32.vlgmr.msra.gmra.mrb[12].mxu0 %v1430_v27  ;;  %2352 = vmatmul.mubr.f32.vlgmr.msra.gmra.mrb[20].mxu1 %v1430_v27 }
 0x67b   :  { %2883 = vmatpush1.bf16.msra.mxu0 %v3207_v17  ;;  %2914 = vmatpush3.bf16.msra.mxu1 %v3234_v41 }
 0x67c   :  { %2885 = vmatprep.subr.bf16.mxu0 %v3210_v18  ;;  %2915 = vmatprep.subr.bf16.mxu1 %v3132_v40 }
 0x67d   :  { %1666 = vmatprep.mubr.f32.mxu0 %v3131_v0  ;;  %2386 = vmatprep.mubr.msk.f32.mxu1 %vm3133_vm0, %v3131_v0 }
 0x67f   :  { %2887 = vmatpush1.bf16.msra.mxu0 %v3218_v25  ;;  %2917 = vmatpush3.bf16.msra.mxu1 %v3247_v51 }
 0x680   :  { %2889 = vmatprep.subr.bf16.mxu0 %v3221_v26  ;;  %2918 = vmatprep.subr.bf16.mxu1 %v3132_v40 }
 0x683   :  { %2891 = vmatpush1.bf16.msra.mxu0 %v3228_v34  ;;  %2920 = vmatpush3.bf16.msra.mxu1 %v3261_v61 }
 0x684   :  { %2893 = vmatprep.subr.bf16.mxu0 %v3231_v35  ;;  %2921 = vmatprep.subr.bf16.mxu1 %v3132_v40 }
 0x687   :  { %2895 = vmatpush1.bf16.msra.mxu0 %v3241_v45  ;;  %2923 = vmatpush3.bf16.msra.mxu1 %v3278_v10 }
 0x688   :  { %2897 = vmatprep.subr.bf16.mxu0 %v3244_v46  ;;  %2924 = vmatprep.subr.bf16.mxu1 %v3132_v40 }
 0x68b   :  { %2899 = vmatpush1.bf16.msra.mxu0 %v3255_v55  ;;  %2926 = vmatpush3.bf16.msra.mxu1 %v3292_v20 }
 0x68c   :  { %2901 = vmatprep.subr.bf16.mxu0 %v3258_v56  ;;  %2927 = vmatprep.subr.bf16.mxu1 %v3132_v40 }
 0x68f   :  { %2903 = vmatpush1.bf16.msra.mxu0 %v3269_v2  ;;  %2929 = vmatpush3.bf16.msra.mxu1 %v3303_v24 }
 0x690   :  { %2905 = vmatprep.subr.bf16.mxu0 %v3275_v4  ;;  %2930 = vmatprep.subr.bf16.mxu1 %v3132_v40 }
 0x693   :  { %2907 = vmatpush1.bf16.msra.mxu0 %v3283_v13  ;;  %2932 = vmatpush3.bf16.msra.mxu1 %v3310_v29 }
 0x694   :  { %2909 = vmatprep.subr.bf16.mxu0 %v3289_v15  ;;  %2933 = vmatprep.subr.bf16.mxu1 %v3132_v40 }
 0x697   :  { %2911 = vmatpush1.bf16.msra.mxu0 %v3299_v23  ;;  %2935 = vmatpush3.bf16.msra.mxu1 %v3318_v32  ;;  %v1770_v32 = vld [vmem:[%s3695_s5] sm:$0xff] }
 0x698   :  { %2936 = vmatprep.subr.bf16.mxu0 %v3132_v40 }
 0x74d   :  { %v1501_v17 = vpop.f32.mrb[12].mxu0  ;;  %v1572_v18 = vpop.f32.mrb[20].mxu1 }
 0x74e   :  { %v2972_v25 = vadd.f32 %v1501_v17, %v3373_v3  ;;  %v1503_v26 = vpop.f32.mrb[13].mxu0  ;;  %v2353_v34 = vpop.f32.mrb[21].mxu1  ;;  %v1590_v61 = vadd.f32 %v3382_v28, %v1572_v18 }
 0x74f   :  { %v2973_v41 = vadd.f32 %v1503_v26, %v3375_v6 }
 0x750   :  { %v1883_v35 = vmul.f32 -1.442695, %v2972_v25 }
 0x751   :  { %v1884_v45 = vmul.f32 -1.442695, %v2973_v41  ;;  %v1887_v41 = vld [vmem:[%s3696_s6] ss:$0 sm:$0xff] }
 0x752   :  { %3059 = vpow2.f32 %v1883_v35 }
 0x753   :  { %3061 = vpow2.f32 %v1884_v45 }
 0x75c   :  { %v3060_v46 = vpop.eup %3059 }
 0x75d   :  { %v1580_v51 = vadd.f32 1.0, %v3060_v46  ;;  %v3062_v55 = vpop.eup %3061 }
 0x75e   :  { %v1587_v56 = vadd.f32 1.0, %v3062_v55 }
 0x75f   :  { %3063 = vrcp.f32 %v1580_v51 }
 0x760   :  { %3065 = vrcp.f32 %v1587_v56 }
 0x769   :  { %v3064_v2 = vpop.eup %3063 }
 0x76a   :  { %v1591_v4 = vmul.f32 %v3064_v2, %v1590_v61  ;;  %v3066_v13 = vpop.eup %3065 }
 0x76b   :  { %v1594_v15 = vsub.f32 1.0, %v3066_v13  ;;  %v1596_v24 = vmul.f32 %v3066_v13, %v1430_v27 }
 0x76c   :  { %v1592_v10 = vadd.f32 %v1591_v4, %v3371_v62  ;;  %v2937_v62 = vpack.c.bf16 %v1771_v53, %v1770_v32 }
 0x76e   :  { %3067 = vtanh.f32 %v1592_v10 }
 0x778   :  { %v3068_v20 = vpop.eup %3067 }
 0x779   :  { %v1595_v23 = vmul.f32 %v3068_v20, %v1594_v15 }
 0x77b   :  { %v3618_v29 = vadd.f32 %v1596_v24, %v1595_v23 }
 0x77d   :  { %1667 = vmatmul.mubr.f32.vlgmr.msra.gmra.mrb[14].mxu0 %v3618_v29  ;;  %2387 = vmatmul.mubr.f32.vlgmr.msra.gmra.mrb[22].mxu1 %v3618_v29 }
 0x77e   :  { %2421 = vmatprep.mubr.msk.f32.mxu0 %vm3133_vm0, %v3131_v0  ;;  %2938 = vmatpush3.bf16.msra.mxu0 %v2937_v62  ;;  %v1773_v0 = vld [vmem:[%s3695_s5 + $0x18] sm:$0xff] }
 0x77f   :  { %2939 = vmatprep.subr.bf16.mxu0 %v3132_v40  ;;  %v2940_v31 = vpack.c.bf16 %v1773_v0, %v1772_v30 }
 0x782   :  { %2941 = vmatpush3.bf16.msra.mxu0 %v2940_v31 }
 0x783   :  { %2942 = vmatprep.subr.bf16.mxu0 %v3132_v40 }
 0x786   :  { %2944 = vmatpush3.bf16.msra.mxu0 %v2943_v37 }
 0x787   :  { %2945 = vmatprep.subr.bf16.mxu0 %v3132_v40 }
 0x78a   :  { %2947 = vmatpush3.bf16.msra.mxu0 %v2946_v42 }
 0x78b   :  { %2948 = vmatprep.subr.bf16.mxu0 %v3132_v40 }
 0x78e   :  { %2950 = vmatpush3.bf16.msra.mxu0 %v2949_v52 }
 0x78f   :  { %2951 = vmatprep.subr.bf16.mxu0 %v3132_v40 }
 0x792   :  { %2953 = vmatpush3.bf16.msra.mxu0 %v2952_v58 }
 0x793   :  { %2954 = vmatprep.subr.bf16.mxu0 %v3132_v40 }
 0x796   :  { %2956 = vmatpush3.bf16.msra.mxu0 %v2955_v60 }
 0x797   :  { %2957 = vmatprep.subr.bf16.mxu0 %v3132_v40 }
 0x79a   :  { %2959 = vmatpush3.bf16.msra.mxu0 %v2958_v5 }
 0x850   :  { %v1668_v7 = vpop.f32.mrb[14].mxu0  ;;  %v1739_v48 = vpop.f32.mrb[22].mxu1 }
 0x851   :  { %v2974_v8 = vadd.f32 %v1668_v7, %v3373_v3  ;;  %v1670_v9 = vpop.f32.mrb[15].mxu0  ;;  %v2388_v11 = vpop.f32.mrb[23].mxu1  ;;  %v1757_v40 = vadd.f32 %v3382_v28, %v1739_v48 }
 0x852   :  { %v2975_v14 = vadd.f32 %v1670_v9, %v3375_v6 }
 0x853   :  { %v1885_v12 = vmul.f32 -1.442695, %v2974_v8 }
 0x854   :  { %v1886_v16 = vmul.f32 -1.442695, %v2975_v14 }
 0x855   :  { %3069 = vpow2.f32 %v1885_v12 }
 0x856   :  { %3071 = vpow2.f32 %v1886_v16 }
 0x85f   :  { %v3070_v19 = vpop.eup %3069 }
 0x860   :  { %v1747_v21 = vadd.f32 1.0, %v3070_v19  ;;  %v3072_v22 = vpop.eup %3071 }
 0x861   :  { %v1754_v50 = vadd.f32 1.0, %v3072_v22 }
 0x862   :  { %3073 = vrcp.f32 %v1747_v21 }
 0x863   :  { %3075 = vrcp.f32 %v1754_v50 }
 0x86c   :  { %v3074_v27 = vpop.eup %3073 }
 0x86d   :  { %v1758_v17 = vmul.f32 %v3074_v27, %v1757_v40  ;;  %v3076_v18 = vpop.eup %3075 }
 0x86e   :  { %v1761_v25 = vsub.f32 1.0, %v3076_v18  ;;  %v1763_v34 = vmul.f32 %v3076_v18, %v3618_v29 }
 0x86f   :  { %v1759_v3 = vadd.f32 %v1758_v17, %v3369_v59 }
 0x871   :  { %3077 = vtanh.f32 %v1759_v3 }
 0x87b   :  { %v3078_v26 = vpop.eup %3077 }
 0x87c   :  { %v1762_v6 = vmul.f32 %v3078_v26, %v1761_v25 }
 0x87e   :  { %v1764_v35 = vadd.f32 %v1763_v34, %v1762_v6 }
 0x880   :  { %2422 = vmatmul.mubr.f32.vlgmr.msra.gmra.mrb[16].mxu0 %v1764_v35 }
 0x953   :  { %v1859_v45 = vpop.f32.mrb[16].mxu0 }
 0x954   :  { %v1860_v28 = vadd.f32 %v1887_v41, %v1859_v45  ;;  %v2423_v46 = vpop.f32.mrb[17].mxu0 }
 0x956   :  { %1863 = vst [vmem:[%s3697_s7] sm:$0xff] %v1860_v28 }
 0x957   :  { %1868 = vsyncpa [#allocation5], 1 }
 0x958   :  { %1869 = vsyncpa [#allocation7], 1 }

</bundles_post_ra>
